<compile_context>
chip_gen: v7x
topology: tpu7x:2x2x1
jax: 0.10.0
libtpu: 0.0.40
codegen_flags: <defaults>
</compile_context>

<pallas_src>
import math
import functools

import numpy as np
import jax
import jax.numpy as jnp
from jax.experimental import pallas as pl
from jax.experimental.pallas import tpu as pltpu


# --------------------------------------------------------------------------- #
# Kernel
# --------------------------------------------------------------------------- #
def _mha_kernel(
    x_ref,                                   # (S, D) full sequence for this batch
    wq_ref, bq_ref, wk_ref, bk_ref, wv_ref, bv_ref,
    wo_ref, bo_ref, g_ref, beta_ref,
    *outs_and_scratch,
    n_heads, d_k, q_tile, compute_dtype, return_attn,
):
    if return_attn:
        out_ref, attn_ref, k_cache, v_cache = outs_and_scratch
    else:
        out_ref, k_cache, v_cache = outs_and_scratch
        attn_ref = None

    eps = 1e-5
    s_len, _ = x_ref.shape
    hd = n_heads * d_k
    f32_compute = np.dtype(compute_dtype) == np.dtype(np.float32)

    # ---- build the K/V cache once per batch (first query tile only) --------
    @pl.when(pl.program_id(1) == 0)
    def _():
        xkv = x_ref[...].astype(compute_dtype)                       # (S, D)
        k = jnp.dot(xkv, wk_ref[...],
                    preferred_element_type=jnp.float32) + bk_ref[...]
        v = jnp.dot(xkv, wv_ref[...],
                    preferred_element_type=jnp.float32) + bv_ref[...]
        # head-split relayout done ONCE per batch: (S, H*d_k) -> (H, S, d_k)
        k_cache[...] = jnp.transpose(
            k.reshape(s_len, n_heads, d_k), (1, 0, 2)).astype(compute_dtype)
        v_cache[...] = jnp.transpose(
            v.reshape(s_len, n_heads, d_k), (1, 0, 2)).astype(compute_dtype)

    # ---- query tile (rows sliced from the single x block; also the residual)
    q_start = pl.multiple_of(pl.program_id(1) * q_tile, q_tile)
    xq = x_ref[pl.ds(q_start, q_tile), :]                            # (tq, D) f32
    q = jnp.dot(xq.astype(compute_dtype), wq_ref[...],
                preferred_element_type=jnp.float32) + bq_ref[...]
    q = q * (1.0 / math.sqrt(d_k))              # fold 1/sqrt(d_k) into q (cheap)
    qh = jnp.transpose(
        q.reshape(q_tile, n_heads, d_k), (1, 0, 2)).astype(compute_dtype)

    kh = k_cache[...]
    vh = v_cache[...]

    # ---- scaled dot-product attention, all heads batched -------------------
    scores = jnp.einsum("hqd,hkd->hqk", qh, kh,
                        preferred_element_type=jnp.float32)          # (H, tq, S)
    scores = scores - jnp.max(scores, axis=-1, keepdims=True)
    if f32_compute:
        e = jnp.exp(scores)
    else:
        # bf16 EUP path on v6e/v7x; stats stay f32
        e = jnp.exp(scores.astype(compute_dtype)).astype(jnp.float32)
    denom = jnp.sum(e, axis=-1, keepdims=True)
    inv = pl.reciprocal(denom)                  # exact: rows sum to 1 (O(H*tq))

    if return_attn:
        attn = e * inv
        attn_ref[...] = attn.astype(attn_ref.dtype)
        ctx = jnp.einsum("hqk,hkd->hqd", attn.astype(compute_dtype), vh,
                         preferred_element_type=jnp.float32)         # (H, tq, dk)
    else:
        # skip the O(H*tq*S) normalize; scale the O(H*tq*dk) context instead
        ctx = jnp.einsum("hqk,hkd->hqd", e.astype(compute_dtype), vh,
                         preferred_element_type=jnp.float32)
        ctx = ctx * inv

    # merge heads: (H, tq, d_k) -> (tq, H*d_k)
    ctx = jnp.transpose(ctx, (1, 0, 2)).reshape(q_tile, hd)

    # ---- output projection + residual + LayerNorm (f32) --------------------
    o = jnp.dot(ctx.astype(compute_dtype), wo_ref[...],
                preferred_element_type=jnp.float32) + bo_ref[...]
    h = o + xq
    mu = jnp.mean(h, axis=-1, keepdims=True)
    var = jnp.mean((h - mu) ** 2, axis=-1, keepdims=True)
    ln = (h - mu) * jax.lax.rsqrt(var + eps) * g_ref[...] + beta_ref[...]
    out_ref[...] = ln.astype(out_ref.dtype)


# --------------------------------------------------------------------------- #
# Wrapper helpers
# --------------------------------------------------------------------------- #
def _round_up(x, m):
    return -(-x // m) * m


def _vmem_capacity_bytes():
    try:
        cap = int(getattr(pltpu.get_tpu_info(), "vmem_capacity_bytes", 0))
        if cap > 0:
            return cap
    except Exception:
        pass
    return 64 * 1024 * 1024       # conservative per-core fallback (v7x)


def _default_compute_dtype():
    # bf16 matmul inputs (f32 accumulation) on v6e/v7x; f32 elsewhere (v5e has no
    # bf16 VPU/EUP and we want module parity by default on unknown chips).
    try:
        kind = jax.devices()[0].device_kind.lower()
    except Exception:
        return jnp.float32
    if ("v6" in kind) or ("v7" in kind):
        return jnp.bfloat16
    return jnp.float32


def _pick_q_tile(S, D, Hd, n_heads, d_k, compute_dtype, return_attn, attn_dtype,
                 vmem_budget):
    """Largest query tile whose per-step VMEM footprint fits the budget."""
    cb = np.dtype(compute_dtype).itemsize
    ab = np.dtype(attn_dtype).itemsize
    lane = 128
    s_pad = _round_up(S, lane)
    dk_pad = _round_up(d_k, lane)
    d_pad = _round_up(D, lane)
    hd_pad = _round_up(Hd, lane)
    s8 = _round_up(S, 8)

    # residency independent of the query tile
    fixed = (3 * D * hd_pad + Hd * d_pad) * cb          # weights (single-buffered)
    fixed += (3 * hd_pad + 3 * d_pad) * 4               # biases + LN params
    fixed += 2 * s8 * d_pad * 4                         # x block (double-buffered)
    fixed += 2 * n_heads * s8 * dk_pad * cb             # persistent K/V caches

    def per_tile(t):
        n = 2 * t * d_pad * 4                           # out block (double-buffered)
        if return_attn:
            n += 2 * n_heads * t * s_pad * ab           # attn block (double-buffered)
        n += 3 * n_heads * t * s_pad * 4                # scores / exp / probs temps
        n += 4 * t * hd_pad * 4                         # q / qh / ctx temps
        return n

    cands = sorted({t for t in range(8, S + 1, 8) if S % t == 0} | {S}, reverse=True)
    for t in cands:
        if fixed + per_tile(t) <= vmem_budget:
            return t
    return cands[-1]


def _const_spec(shape):
    """Constant-index operand: fetched once, single-buffered (pure VMEM saving)."""
    idx = lambda b, i: (0,) * len(shape)
    try:
        return pl.BlockSpec(shape, idx, pipeline_mode=pl.Buffered(1))
    except TypeError:                      # older BlockSpec without pipeline_mode
        return pl.BlockSpec(shape, idx)


# --------------------------------------------------------------------------- #
# Public entry point
# --------------------------------------------------------------------------- #
def multi_head_attention(x, params, *, n_heads, d_k, compute_dtype=None,
                         q_tile=None, return_attn=True, attn_dtype=jnp.float32):
    """x: (B, S, d_embed) float32 ->
         (out (B, S, D), attn (B, H, S, S))   if return_attn
          out (B, S, D)                       otherwise
    """
    B, S, D = x.shape
    Hd = n_heads * d_k
    assert params["wq"].shape == (D, Hd)

    if compute_dtype is None:
        compute_dtype = _default_compute_dtype()

    vmem_cap = _vmem_capacity_bytes()
    if q_tile is None:
        q_tile = _pick_q_tile(S, D, Hd, n_heads, d_k, compute_dtype,
                              return_attn, attn_dtype, int(0.65 * vmem_cap))
    assert S % q_tile == 0
    assert q_tile == S or q_tile % 8 == 0, "query tile must be sublane-aligned"
    num_q_tiles = S // q_tile

    # Cast weights in the wrapper so the HBM->VMEM DMA is already narrow when
    # compute_dtype is bf16 (v6e/v7x).  Biases / LN params stay f32.
    wq = params["wq"].astype(compute_dtype)
    wk = params["wk"].astype(compute_dtype)
    wv = params["wv"].astype(compute_dtype)
    wo = params["wo"].astype(compute_dtype)

    kernel = functools.partial(
        _mha_kernel, n_heads=n_heads, d_k=d_k, q_tile=q_tile,
        compute_dtype=compute_dtype, return_attn=return_attn)

    in_specs = [
        pl.BlockSpec((None, S, D), lambda b, i: (b, 0, 0)),  # x (full seq, per batch)
        _const_spec((D, Hd)), _const_spec((1, Hd)),          # W_Q, b_Q
        _const_spec((D, Hd)), _const_spec((1, Hd)),          # W_K, b_K
        _const_spec((D, Hd)), _const_spec((1, Hd)),          # W_V, b_V
        _const_spec((Hd, D)), _const_spec((1, D)),           # fc
        _const_spec((1, D)), _const_spec((1, D)),            # layer_norm gamma, beta
    ]
    out_specs = [pl.BlockSpec((None, q_tile, D), lambda b, i: (b, i, 0))]
    out_shape = [jax.ShapeDtypeStruct((B, S, D), x.dtype)]
    if return_attn:
        out_specs.append(
            pl.BlockSpec((None, n_heads, q_tile, S), lambda b, i: (b, 0, i, 0)))
        out_shape.append(jax.ShapeDtypeStruct((B, n_heads, S, S), attn_dtype))

    grid_spec = pltpu.PrefetchScalarGridSpec(
        num_scalar_prefetch=0,
        grid=(B, num_q_tiles),
        in_specs=in_specs,
        out_specs=tuple(out_specs),
        scratch_shapes=[
            pltpu.VMEM((n_heads, S, d_k), compute_dtype),    # K cache (per batch)
            pltpu.VMEM((n_heads, S, d_k), compute_dtype),    # V cache (per batch)
        ],
    )

    outs = pl.pallas_call(
        kernel,
        grid_spec=grid_spec,
        out_shape=tuple(out_shape),
        compiler_params=pltpu.CompilerParams(
            # batch axis parallel (megacore split); q-tile axis arbitrary because
            # the K/V caches carry state across it.
            dimension_semantics=("parallel", "arbitrary"),
            vmem_limit_bytes=int(0.9 * vmem_cap),
        ),
    )(
        x,
        wq, params["bq"], wk, params["bk"], wv, params["bv"],
        wo, params["bo"], params["ln_g"], params["ln_b"],
    )

    return outs if return_attn else outs[0]


# --------------------------------------------------------------------------- #
# Params / reference
# --------------------------------------------------------------------------- #
def init_params(key, d_embed, d_k, n_heads):
    Hd = d_k * n_heads
    ks = jax.random.split(key, 8)

    def u(k, shp, fan_in):
        lim = 1.0 / math.sqrt(fan_in)
        return jax.random.uniform(k, shp, jnp.float32, -lim, lim)

    return {
        # Linear weights stored as (in, out)  (PyTorch weight.T)
        "wq": u(ks[0], (d_embed, Hd), d_embed), "bq": u(ks[1], (1, Hd), d_embed),
        "wk": u(ks[2], (d_embed, Hd), d_embed), "bk": u(ks[3], (1, Hd), d_embed),
        "wv": u(ks[4], (d_embed, Hd), d_embed), "bv": u(ks[5], (1, Hd), d_embed),
        "wo": u(ks[6], (Hd, d_embed), Hd),      "bo": u(ks[7], (1, d_embed), Hd),
        "ln_g": jnp.ones((1, d_embed), jnp.float32),
        "ln_b": jnp.zeros((1, d_embed), jnp.float32),
    }


def _reference(x, params, n_heads, d_k):
    """Pure-JAX reference mirroring the PyTorch module."""
    B, S, D = x.shape
    q = x @ params["wq"] + params["bq"]
    k = x @ params["wk"] + params["bk"]
    v = x @ params["wv"] + params["bv"]

    def split(t):
        return jnp.transpose(t.reshape(B, S, n_heads, d_k), (0, 2, 1, 3))

    qh, kh, vh = split(q), split(k), split(v)
    s = jnp.einsum("bhqd,bhkd->bhqk", qh, kh) / math.sqrt(d_k)
    a = jax.nn.softmax(s, axis=-1)
    ctx = jnp.einsum("bhqk,bhkd->bhqd", a, vh)
    ctx = jnp.transpose(ctx, (0, 2, 1, 3)).reshape(B, S, n_heads * d_k)
    o = ctx @ params["wo"] + params["bo"]
    h = o + x
    mu = jnp.mean(h, axis=-1, keepdims=True)
    var = jnp.mean((h - mu) ** 2, axis=-1, keepdims=True)
    ln = (h - mu) / jnp.sqrt(var + 1e-5) * params["ln_g"] + params["ln_b"]
    return ln, a


# --------------------------------------------------------------------------- #
# Self-test
# --------------------------------------------------------------------------- #
if __name__ == "__main__":
    # true-f32 matmuls everywhere so the reference matches the kernel's f32 path
    jax.config.update("jax_default_matmul_precision", "highest")

    B, S = 2, 16
    d_embed, d_k, n_heads = 32, 8, 4

    key = jax.random.PRNGKey(0)
    kx, kp = jax.random.split(key)
    x = jax.random.normal(kx, (B, S, d_embed), jnp.float32)
    params = init_params(kp, d_embed, d_k, n_heads)

    ref_out, ref_attn = _reference(x, params, n_heads, d_k)

    # --- run 1: f32, attn returned, forced q_tile=8 (2 q-tiles -> exercises the
    #            per-batch K/V cache and the dynamic query-row slice) ----------
    out, attn = multi_head_attention(
        x, params, n_heads=n_heads, d_k=d_k,
        compute_dtype=jnp.float32, q_tile=8, return_attn=True)
    jax.block_until_ready((out, attn))

    assert out.shape == (B, S, d_embed)
    assert attn.shape == (B, n_heads, S, S)
    assert bool(jnp.all(jnp.isfinite(out))) and bool(jnp.all(jnp.isfinite(attn)))
    assert bool(jnp.allclose(attn, ref_attn, atol=2e-3, rtol=2e-3))
    assert bool(jnp.allclose(out, ref_out, atol=2e-3, rtol=2e-3))

    # --- run 2: bf16 matmul inputs (v6e/v7x fast path), attn dropped, auto tile
    out_bf16 = multi_head_attention(
        x, params, n_heads=n_heads, d_k=d_k,
        compute_dtype=jnp.bfloat16, return_attn=False)
    jax.block_until_ready(out_bf16)

    assert out_bf16.shape == (B, S, d_embed)
    assert bool(jnp.all(jnp.isfinite(out_bf16)))
    assert bool(jnp.allclose(out_bf16, ref_out, atol=2e-1, rtol=2e-1))

    print("KERNEL_OK")
</pallas_src>

<mosaic_0001>
module attributes {stable_mosaic.version = 11 : i64} {
  func.func @_mha_kernel(%arg0: i32, %arg1: i32, %arg2: memref<1x16x32xf32, #tpu.memory_space<vmem>>, %arg3: memref<32x32xf32, #tpu.memory_space<vmem>>, %arg4: memref<1x32xf32, #tpu.memory_space<vmem>>, %arg5: memref<32x32xf32, #tpu.memory_space<vmem>>, %arg6: memref<1x32xf32, #tpu.memory_space<vmem>>, %arg7: memref<32x32xf32, #tpu.memory_space<vmem>>, %arg8: memref<1x32xf32, #tpu.memory_space<vmem>>, %arg9: memref<32x32xf32, #tpu.memory_space<vmem>>, %arg10: memref<1x32xf32, #tpu.memory_space<vmem>>, %arg11: memref<1x32xf32, #tpu.memory_space<vmem>>, %arg12: memref<1x32xf32, #tpu.memory_space<vmem>>, %arg13: memref<1x8x32xf32, #tpu.memory_space<vmem>>, %arg14: memref<1x4x8x16xf32, #tpu.memory_space<vmem>>, %arg15: memref<4x16x8xf32, #tpu.memory_space<vmem>>, %arg16: memref<4x16x8xf32, #tpu.memory_space<vmem>>) attributes {dimension_semantics = [#tpu.dimension_semantics<parallel>, #tpu.dimension_semantics<arbitrary>], iteration_bounds = array<i64: 2, 2>, scalar_prefetch = 0 : i64, scratch_operands = 2 : i64, tpu.core_type = #tpu.core_type<tc>, window_params = [{transform_indices = @transform_0, window_bounds = array<i64: 1, 16, 32>}, {pipeline_mode = #tpu.pipeline_mode<synchronous>, transform_indices = @transform_1, window_bounds = array<i64: 32, 32>}, {pipeline_mode = #tpu.pipeline_mode<synchronous>, transform_indices = @transform_2, window_bounds = array<i64: 1, 32>}, {pipeline_mode = #tpu.pipeline_mode<synchronous>, transform_indices = @transform_3, window_bounds = array<i64: 32, 32>}, {pipeline_mode = #tpu.pipeline_mode<synchronous>, transform_indices = @transform_4, window_bounds = array<i64: 1, 32>}, {pipeline_mode = #tpu.pipeline_mode<synchronous>, transform_indices = @transform_5, window_bounds = array<i64: 32, 32>}, {pipeline_mode = #tpu.pipeline_mode<synchronous>, transform_indices = @transform_6, window_bounds = array<i64: 1, 32>}, {pipeline_mode = #tpu.pipeline_mode<synchronous>, transform_indices = @transform_7, window_bounds = array<i64: 32, 32>}, {pipeline_mode = #tpu.pipeline_mode<synchronous>, transform_indices = @transform_8, window_bounds = array<i64: 1, 32>}, {pipeline_mode = #tpu.pipeline_mode<synchronous>, transform_indices = @transform_9, window_bounds = array<i64: 1, 32>}, {pipeline_mode = #tpu.pipeline_mode<synchronous>, transform_indices = @transform_10, window_bounds = array<i64: 1, 32>}, {transform_indices = @transform_11, window_bounds = array<i64: 1, 8, 32>}, {transform_indices = @transform_12, window_bounds = array<i64: 1, 4, 8, 16>}]} {
    %c0_i32 = arith.constant 0 : i32
    %0 = arith.cmpi eq, %arg1, %c0_i32 : i32
    %1 = arith.extui %0 : i1 to i32
    %c0_i32_0 = arith.constant 0 : i32
    %2 = arith.cmpi ne, %1, %c0_i32_0 : i32
    scf.if %2 {
      %c0_38 = arith.constant 0 : index
      %c0_39 = arith.constant 0 : index
      %c0_40 = arith.constant 0 : index
      %69 = vector.load %arg2[%c0_38, %c0_39, %c0_40] : memref<1x16x32xf32, #tpu.memory_space<vmem>>, vector<1x16x32xf32>
      %70 = vector.shape_cast %69 : vector<1x16x32xf32> to vector<16x32xf32>
      %c0_41 = arith.constant 0 : index
      %c0_42 = arith.constant 0 : index
      %71 = vector.load %arg5[%c0_41, %c0_42] : memref<32x32xf32, #tpu.memory_space<vmem>>, vector<32x32xf32>
      %cst_43 = arith.constant dense<0.000000e+00> : vector<16x32xf32>
      %72 = tpu.matmul %70, %71, %cst_43 {dimension_numbers = #tpu.dot_dimension_numbers<[1], [0], [0], [1], [0, 0, 1, 1], [], []>, precision = #tpu.contract_precision<fp32>} : vector<16x32xf32>, vector<32x32xf32>, vector<16x32xf32> -> vector<16x32xf32>
      %c0_44 = arith.constant 0 : index
      %c0_45 = arith.constant 0 : index
      %73 = vector.load %arg6[%c0_44, %c0_45] : memref<1x32xf32, #tpu.memory_space<vmem>>, vector<1x32xf32>
      %74 = vector.broadcast %73 : vector<1x32xf32> to vector<16x32xf32>
      %75 = arith.addf %72, %74 : vector<16x32xf32>
      %c0_46 = arith.constant 0 : index
      %c0_47 = arith.constant 0 : index
      %76 = vector.load %arg7[%c0_46, %c0_47] : memref<32x32xf32, #tpu.memory_space<vmem>>, vector<32x32xf32>
      %cst_48 = arith.constant dense<0.000000e+00> : vector<16x32xf32>
      %77 = tpu.matmul %70, %76, %cst_48 {dimension_numbers = #tpu.dot_dimension_numbers<[1], [0], [0], [1], [0, 0, 1, 1], [], []>, precision = #tpu.contract_precision<fp32>} : vector<16x32xf32>, vector<32x32xf32>, vector<16x32xf32> -> vector<16x32xf32>
      %c0_49 = arith.constant 0 : index
      %c0_50 = arith.constant 0 : index
      %78 = vector.load %arg8[%c0_49, %c0_50] : memref<1x32xf32, #tpu.memory_space<vmem>>, vector<1x32xf32>
      %79 = vector.broadcast %78 : vector<1x32xf32> to vector<16x32xf32>
      %80 = arith.addf %77, %79 : vector<16x32xf32>
      %81 = vector.shape_cast %75 : vector<16x32xf32> to vector<16x4x8xf32>
      %82 = tpu.transpose %81, [1, 0, 2] : vector<16x4x8xf32> -> vector<4x16x8xf32>
      %c0_51 = arith.constant 0 : index
      %c0_52 = arith.constant 0 : index
      %c0_53 = arith.constant 0 : index
      %83 = vector.load %arg15[%c0_51, %c0_52, %c0_53] : memref<4x16x8xf32, #tpu.memory_space<vmem>>, vector<4x16x8xf32>
      tpu.vector_store %arg15[%c0_51, %c0_52, %c0_53], %82 {strides = array<i32>} : memref<4x16x8xf32, #tpu.memory_space<vmem>>, vector<4x16x8xf32>,
      %84 = vector.shape_cast %80 : vector<16x32xf32> to vector<16x4x8xf32>
      %85 = tpu.transpose %84, [1, 0, 2] : vector<16x4x8xf32> -> vector<4x16x8xf32>
      %c0_54 = arith.constant 0 : index
      %c0_55 = arith.constant 0 : index
      %c0_56 = arith.constant 0 : index
      %86 = vector.load %arg16[%c0_54, %c0_55, %c0_56] : memref<4x16x8xf32, #tpu.memory_space<vmem>>, vector<4x16x8xf32>
      tpu.vector_store %arg16[%c0_54, %c0_55, %c0_56], %85 {strides = array<i32>} : memref<4x16x8xf32, #tpu.memory_space<vmem>>, vector<4x16x8xf32>,
    } else {
    }
    %c8_i32 = arith.constant 8 : i32
    %3 = arith.muli %arg1, %c8_i32 : i32
    %4 = tpu.assume_multiple %3, 8 : i32
    %c0 = arith.constant 0 : index
    %5 = arith.index_cast %4 : i32 to index
    %c0_1 = arith.constant 0 : index
    %6 = vector.load %arg2[%c0, %5, %c0_1] : memref<1x16x32xf32, #tpu.memory_space<vmem>>, vector<1x8x32xf32>
    %7 = vector.shape_cast %6 : vector<1x8x32xf32> to vector<8x32xf32>
    %c0_2 = arith.constant 0 : index
    %c0_3 = arith.constant 0 : index
    %8 = vector.load %arg3[%c0_2, %c0_3] : memref<32x32xf32, #tpu.memory_space<vmem>>, vector<32x32xf32>
    %cst = arith.constant dense<0.000000e+00> : vector<8x32xf32>
    %9 = tpu.matmul %7, %8, %cst {dimension_numbers = #tpu.dot_dimension_numbers<[1], [0], [0], [1], [0, 0, 1, 1], [], []>, precision = #tpu.contract_precision<fp32>} : vector<8x32xf32>, vector<32x32xf32>, vector<8x32xf32> -> vector<8x32xf32>
    %c0_4 = arith.constant 0 : index
    %c0_5 = arith.constant 0 : index
    %10 = vector.load %arg4[%c0_4, %c0_5] : memref<1x32xf32, #tpu.memory_space<vmem>>, vector<1x32xf32>
    %11 = vector.broadcast %10 : vector<1x32xf32> to vector<8x32xf32>
    %12 = arith.addf %9, %11 : vector<8x32xf32>
    %cst_6 = arith.constant 0.353553385 : f32
    %13 = vector.broadcast %cst_6 : f32 to vector<8x32xf32>
    %14 = arith.mulf %12, %13 : vector<8x32xf32>
    %15 = vector.shape_cast %14 : vector<8x32xf32> to vector<8x4x8xf32>
    %16 = tpu.transpose %15, [1, 0, 2] : vector<8x4x8xf32> -> vector<4x8x8xf32>
    %c0_7 = arith.constant 0 : index
    %c0_8 = arith.constant 0 : index
    %c0_9 = arith.constant 0 : index
    %17 = vector.load %arg15[%c0_7, %c0_8, %c0_9] : memref<4x16x8xf32, #tpu.memory_space<vmem>>, vector<4x16x8xf32>
    %c0_10 = arith.constant 0 : index
    %c0_11 = arith.constant 0 : index
    %c0_12 = arith.constant 0 : index
    %18 = vector.load %arg16[%c0_10, %c0_11, %c0_12] : memref<4x16x8xf32, #tpu.memory_space<vmem>>, vector<4x16x8xf32>
    "tpu.trace_start"() <{level = 10 : i32, message = "hqd,hkd->hqk"}> : () -> ()
    %cst_13 = arith.constant dense<0.000000e+00> : vector<4x8x16xf32>
    %19 = tpu.matmul %16, %17, %cst_13 {dimension_numbers = #tpu.dot_dimension_numbers<[2], [2], [1], [1], [0, 0, 0, 1, 1, 1], [0], [0]>, precision = #tpu.contract_precision<fp32>} : vector<4x8x8xf32>, vector<4x16x8xf32>, vector<4x8x16xf32> -> vector<4x8x16xf32>
    "tpu.trace_stop"() : () -> ()
    %cst_14 = arith.constant dense<0xFF800000> : vector<4x8xf32>
    %20 = vector.multi_reduction <maximumf>, %19, %cst_14 [2] : vector<4x8x16xf32> to vector<4x8xf32>
    %21 = vector.shape_cast %20 : vector<4x8xf32> to vector<4x8x1xf32>
    %22 = vector.broadcast %21 : vector<4x8x1xf32> to vector<4x8x16xf32>
    %23 = arith.subf %19, %22 : vector<4x8x16xf32>
    %24 = math.exp %23 : vector<4x8x16xf32>
    %cst_15 = arith.constant dense<0.000000e+00> : vector<4x8xf32>
    %25 = vector.multi_reduction <add>, %24, %cst_15 [2] : vector<4x8x16xf32> to vector<4x8xf32>
    %26 = vector.shape_cast %25 : vector<4x8xf32> to vector<4x8x1xf32>
    %27 = tpu.reciprocal %26 : vector<4x8x1xf32> -> vector<4x8x1xf32>
    %28 = vector.broadcast %27 : vector<4x8x1xf32> to vector<4x8x16xf32>
    %29 = arith.mulf %24, %28 : vector<4x8x16xf32>
    %c0_16 = arith.constant 0 : index
    %c0_17 = arith.constant 0 : index
    %c0_18 = arith.constant 0 : index
    %c0_19 = arith.constant 0 : index
    %30 = vector.load %arg14[%c0_16, %c0_17, %c0_18, %c0_19] : memref<1x4x8x16xf32, #tpu.memory_space<vmem>>, vector<1x4x8x16xf32>
    %31 = vector.shape_cast %30 : vector<1x4x8x16xf32> to vector<4x8x16xf32>
    %32 = vector.shape_cast %29 : vector<4x8x16xf32> to vector<1x4x8x16xf32>
    tpu.vector_store %arg14[%c0_16, %c0_17, %c0_18, %c0_19], %32 {strides = array<i32>} : memref<1x4x8x16xf32, #tpu.memory_space<vmem>>, vector<1x4x8x16xf32>,
    "tpu.trace_start"() <{level = 10 : i32, message = "hqk,hkd->hqd"}> : () -> ()
    %cst_20 = arith.constant dense<0.000000e+00> : vector<4x8x8xf32>
    %33 = tpu.matmul %29, %18, %cst_20 {dimension_numbers = #tpu.dot_dimension_numbers<[2], [1], [1], [2], [0, 0, 0, 1, 1, 2], [0], [0]>, precision = #tpu.contract_precision<fp32>} : vector<4x8x16xf32>, vector<4x16x8xf32>, vector<4x8x8xf32> -> vector<4x8x8xf32>
    "tpu.trace_stop"() : () -> ()
    %34 = tpu.transpose %33, [1, 0, 2] : vector<4x8x8xf32> -> vector<8x4x8xf32>
    %35 = vector.shape_cast %34 : vector<8x4x8xf32> to vector<8x32xf32>
    %c0_21 = arith.constant 0 : index
    %c0_22 = arith.constant 0 : index
    %36 = vector.load %arg9[%c0_21, %c0_22] : memref<32x32xf32, #tpu.memory_space<vmem>>, vector<32x32xf32>
    %cst_23 = arith.constant dense<0.000000e+00> : vector<8x32xf32>
    %37 = tpu.matmul %35, %36, %cst_23 {dimension_numbers = #tpu.dot_dimension_numbers<[1], [0], [0], [1], [0, 0, 1, 1], [], []>, precision = #tpu.contract_precision<fp32>} : vector<8x32xf32>, vector<32x32xf32>, vector<8x32xf32> -> vector<8x32xf32>
    %c0_24 = arith.constant 0 : index
    %c0_25 = arith.constant 0 : index
    %38 = vector.load %arg10[%c0_24, %c0_25] : memref<1x32xf32, #tpu.memory_space<vmem>>, vector<1x32xf32>
    %39 = vector.broadcast %38 : vector<1x32xf32> to vector<8x32xf32>
    %40 = arith.addf %37, %39 : vector<8x32xf32>
    %41 = arith.addf %40, %7 : vector<8x32xf32>
    %cst_26 = arith.constant dense<0.000000e+00> : vector<8xf32>
    %42 = vector.multi_reduction <add>, %41, %cst_26 [1] : vector<8x32xf32> to vector<8xf32>
    %43 = vector.shape_cast %42 : vector<8xf32> to vector<8x1xf32>
    %cst_27 = arith.constant 3.200000e+01 : f32
    %44 = vector.broadcast %cst_27 : f32 to vector<8x1xf32>
    %45 = arith.divf %43, %44 : vector<8x1xf32>
    %46 = vector.broadcast %45 : vector<8x1xf32> to vector<8x32xf32>
    %47 = arith.subf %41, %46 : vector<8x32xf32>
    %48 = arith.mulf %47, %47 : vector<8x32xf32>
    %cst_28 = arith.constant dense<0.000000e+00> : vector<8xf32>
    %49 = vector.multi_reduction <add>, %48, %cst_28 [1] : vector<8x32xf32> to vector<8xf32>
    %50 = vector.shape_cast %49 : vector<8xf32> to vector<8x1xf32>
    %cst_29 = arith.constant 3.200000e+01 : f32
    %51 = vector.broadcast %cst_29 : f32 to vector<8x1xf32>
    %52 = arith.divf %50, %51 : vector<8x1xf32>
    %53 = vector.broadcast %45 : vector<8x1xf32> to vector<8x32xf32>
    %54 = arith.subf %41, %53 : vector<8x32xf32>
    %cst_30 = arith.constant 9.99999974E-6 : f32
    %55 = vector.broadcast %cst_30 : f32 to vector<8x1xf32>
    %56 = arith.addf %52, %55 : vector<8x1xf32>
    %57 = math.rsqrt %56 : vector<8x1xf32>
    %58 = vector.broadcast %57 : vector<8x1xf32> to vector<8x32xf32>
    %59 = arith.mulf %54, %58 : vector<8x32xf32>
    %c0_31 = arith.constant 0 : index
    %c0_32 = arith.constant 0 : index
    %60 = vector.load %arg11[%c0_31, %c0_32] : memref<1x32xf32, #tpu.memory_space<vmem>>, vector<1x32xf32>
    %61 = vector.broadcast %60 : vector<1x32xf32> to vector<8x32xf32>
    %62 = arith.mulf %59, %61 : vector<8x32xf32>
    %c0_33 = arith.constant 0 : index
    %c0_34 = arith.constant 0 : index
    %63 = vector.load %arg12[%c0_33, %c0_34] : memref<1x32xf32, #tpu.memory_space<vmem>>, vector<1x32xf32>
    %64 = vector.broadcast %63 : vector<1x32xf32> to vector<8x32xf32>
    %65 = arith.addf %62, %64 : vector<8x32xf32>
    %c0_35 = arith.constant 0 : index
    %c0_36 = arith.constant 0 : index
    %c0_37 = arith.constant 0 : index
    %66 = vector.load %arg13[%c0_35, %c0_36, %c0_37] : memref<1x8x32xf32, #tpu.memory_space<vmem>>, vector<1x8x32xf32>
    %67 = vector.shape_cast %66 : vector<1x8x32xf32> to vector<8x32xf32>
    %68 = vector.shape_cast %65 : vector<8x32xf32> to vector<1x8x32xf32>
    tpu.vector_store %arg13[%c0_35, %c0_36, %c0_37], %68 {strides = array<i32>} : memref<1x8x32xf32, #tpu.memory_space<vmem>>, vector<1x8x32xf32>,
    return
  }
  func.func @transform_0(%arg0: i32, %arg1: i32) -> (i32, i32, i32) {
    %c0_i32 = arith.constant 0 : i32
    %c0_i32_0 = arith.constant 0 : i32
    %c0_i32_1 = arith.constant 0 : i32
    return %arg0, %c0_i32, %c0_i32_0 : i32, i32, i32
  }
  func.func @transform_1(%arg0: i32, %arg1: i32) -> (i32, i32) {
    %c0_i32 = arith.constant 0 : i32
    %c0_i32_0 = arith.constant 0 : i32
    %c0_i32_1 = arith.constant 0 : i32
    return %c0_i32, %c0_i32_0 : i32, i32
  }
  func.func @transform_2(%arg0: i32, %arg1: i32) -> (i32, i32) {
    %c0_i32 = arith.constant 0 : i32
    %c0_i32_0 = arith.constant 0 : i32
    %c0_i32_1 = arith.constant 0 : i32
    return %c0_i32, %c0_i32_0 : i32, i32
  }
  func.func @transform_3(%arg0: i32, %arg1: i32) -> (i32, i32) {
    %c0_i32 = arith.constant 0 : i32
    %c0_i32_0 = arith.constant 0 : i32
    %c0_i32_1 = arith.constant 0 : i32
    return %c0_i32, %c0_i32_0 : i32, i32
  }
  func.func @transform_4(%arg0: i32, %arg1: i32) -> (i32, i32) {
    %c0_i32 = arith.constant 0 : i32
    %c0_i32_0 = arith.constant 0 : i32
    %c0_i32_1 = arith.constant 0 : i32
    return %c0_i32, %c0_i32_0 : i32, i32
  }
  func.func @transform_5(%arg0: i32, %arg1: i32) -> (i32, i32) {
    %c0_i32 = arith.constant 0 : i32
    %c0_i32_0 = arith.constant 0 : i32
    %c0_i32_1 = arith.constant 0 : i32
    return %c0_i32, %c0_i32_0 : i32, i32
  }
  func.func @transform_6(%arg0: i32, %arg1: i32) -> (i32, i32) {
    %c0_i32 = arith.constant 0 : i32
    %c0_i32_0 = arith.constant 0 : i32
    %c0_i32_1 = arith.constant 0 : i32
    return %c0_i32, %c0_i32_0 : i32, i32
  }
  func.func @transform_7(%arg0: i32, %arg1: i32) -> (i32, i32) {
    %c0_i32 = arith.constant 0 : i32
    %c0_i32_0 = arith.constant 0 : i32
    %c0_i32_1 = arith.constant 0 : i32
    return %c0_i32, %c0_i32_0 : i32, i32
  }
  func.func @transform_8(%arg0: i32, %arg1: i32) -> (i32, i32) {
    %c0_i32 = arith.constant 0 : i32
    %c0_i32_0 = arith.constant 0 : i32
    %c0_i32_1 = arith.constant 0 : i32
    return %c0_i32, %c0_i32_0 : i32, i32
  }
  func.func @transform_9(%arg0: i32, %arg1: i32) -> (i32, i32) {
    %c0_i32 = arith.constant 0 : i32
    %c0_i32_0 = arith.constant 0 : i32
    %c0_i32_1 = arith.constant 0 : i32
    return %c0_i32, %c0_i32_0 : i32, i32
  }
  func.func @transform_10(%arg0: i32, %arg1: i32) -> (i32, i32) {
    %c0_i32 = arith.constant 0 : i32
    %c0_i32_0 = arith.constant 0 : i32
    %c0_i32_1 = arith.constant 0 : i32
    return %c0_i32, %c0_i32_0 : i32, i32
  }
  func.func @transform_11(%arg0: i32, %arg1: i32) -> (i32, i32, i32) {
    %c0_i32 = arith.constant 0 : i32
    %c0_i32_0 = arith.constant 0 : i32
    return %arg0, %arg1, %c0_i32 : i32, i32, i32
  }
  func.func @transform_12(%arg0: i32, %arg1: i32) -> (i32, i32, i32, i32) {
    %c0_i32 = arith.constant 0 : i32
    %c0_i32_0 = arith.constant 0 : i32
    %c0_i32_1 = arith.constant 0 : i32
    return %arg0, %c0_i32, %arg1, %c0_i32_0 : i32, i32, i32, i32
  }
}

</mosaic_0001>

<bundles_post_ra>
// kernel: tpu_custom_call.1
= control target key start
LH: loop header
LB: loop body
LE: loop exit
PB: predicated region body
PF: predicated region fallthrough
CT: control target
= control target key end

     0   :  { %s10582_s0 = inlined_call_operand.hbm [shape: f32[2,16,32], index: 0, kind: input, shape index: {}]   ;;  %s10583_s1 = inlined_call_operand.hbm [shape: f32[32,32], index: 1, kind: input, shape index: {}]   ;;  %s10584_s2 = inlined_call_operand.vmem [shape: f32[1,32], index: 2, kind: input, shape index: {}]   ;;  %s10585_s3 = inlined_call_operand.hbm [shape: f32[32,32], index: 3, kind: input, shape index: {}]   ;;  %s10586_s4 = inlined_call_operand.vmem [shape: f32[1,32], index: 4, kind: input, shape index: {}]   ;;  %s10587_s5 = inlined_call_operand.hbm [shape: f32[32,32], index: 5, kind: input, shape index: {}]   ;;  %s10588_s6 = inlined_call_operand.vmem [shape: f32[1,32], index: 6, kind: input, shape index: {}]   ;;  %s10589_s7 = inlined_call_operand.hbm [shape: f32[32,32], index: 7, kind: input, shape index: {}]   ;;  %s10590_s8 = inlined_call_operand.vmem [shape: f32[1,32], index: 8, kind: input, shape index: {}]   ;;  %s10591_s9 = inlined_call_operand.vmem [shape: f32[1,32], index: 9, kind: input, shape index: {}]   ;;  %s10592_s10 = inlined_call_operand.vmem [shape: f32[1,32], index: 10, kind: input, shape index: {}]   ;;  %s10593_s11 = inlined_call_operand.hbm [shape: f32[2,16,32], index: 11, kind: output, shape index: {0}]   ;;  %s10594_s12 = inlined_call_operand.hbm [shape: f32[2,4,16,16], index: 12, kind: output, shape index: {1}]  }
   0x1   :  { %10611 = sst [smem:[#allocation26_spill]] %s10582_s0 }
   0x2   :  { %10612 = sst [smem:[#allocation27_spill]] %s10583_s1 }
   0x3   :  { %10613 = sst [smem:[#allocation28_spill]] %s10584_s2 }
   0x4   :  { %10614 = sst [smem:[#allocation29_spill]] %s10585_s3 }
   0x5   :  { %10615 = sst [smem:[#allocation30_spill]] %s10586_s4 }
   0x6   :  { %10616 = sst [smem:[#allocation31_spill]] %s10587_s5 }
   0x7   :  { %10617 = sst [smem:[#allocation32_spill]] %s10588_s6 }
   0x8   :  { %10618 = sst [smem:[#allocation33_spill]] %s10589_s7 }
   0x9   :  { %10619 = sst [smem:[#allocation34_spill]] %s10590_s8 }
   0xa   :  { %10620 = sst [smem:[#allocation35_spill]] %s10591_s9 }
   0xb   :  { %10621 = sst [smem:[#allocation36_spill]] %s10592_s10 }
   0xc   :  { %10622 = sst [smem:[#allocation37_spill]] %s10593_s11 }
   0xd   :  { %10623 = sst [smem:[#allocation38_spill]] %s10594_s12 }
   0xe   :  { %18 = vsyncpa [#allocation5], 0 }
   0xf   :  { %20 = vsyncpa [#allocation5 + $0x1], 0 }
  0x10   :  { %21 = vsyncpa [#allocation8], 0 }
  0x11   :  { %22 = vsyncpa [#allocation11], 0 }
  0x12   :  { %23 = vsyncpa [#allocation6], 0 }
  0x13   :  { %25 = vsyncpa [#allocation6 + $0x1], 0 }
  0x14   :  { %26 = vsyncpa [#allocation15], 0 }
  0x15   :  { %28 = vsyncpa [#allocation15 + $0x1], 0  ;;  %s9459_s21 = smov 0   ;;  %s9461_s22 = smov 0  }
  0x16   :  { %s9463_s23 = smov 0   ;;  %s9465_s24 = smov 0  }
  0x17   :  { %s9467_s25 = smov 0   ;;  %s9469_s26 = smov 0  }
  0x18   :  { %s9471_s27 = smov 0   ;;  %s9473_s28 = smov 0  }
  0x19   :  { %s9475_s29 = smov 0   ;;  %s9477_s30 = smov 0  }
  0x1a   :  { %s9479_s13 = smov 0  }
  0x1b LB: > { %10624 = sst [smem:[#allocation21_spill]] %s9325_s21  ;;  %s7523_s14 = sadd.s32 4294967295, %s9365_s13   ;;  %s9365_s13 = sphi %s9479_s13, %s34_s13   ;;  %s9361_s30 = sphi %s9477_s30, %s10677_s30   ;;  %s9357_s29 = sphi %s9475_s29, %s10676_s29   ;;  %s9353_s28 = sphi %s9473_s28, %s10675_s28   ;;  %s9349_s27 = sphi %s9471_s27, %s10674_s27   ;;  %s9345_s26 = sphi %s9469_s26, %s10673_s26   ;;  %s9341_s25 = sphi %s9467_s25, %s10672_s25   ;;  %s9337_s24 = sphi %s9465_s24, %s10671_s24   ;;  %s9333_s23 = sphi %s9463_s23, %s10670_s23   ;;  %s9329_s22 = sphi %s9461_s22, %s10669_s22   ;;  %s9325_s21 = sphi %s9459_s21, %s10668_s21  }
  0x1c   : > { %10625 = sst [smem:[#allocation22_spill]] %s9349_s27  ;;  %s7524_s15 = sadd.s32 4294967294, %s9365_s13  }
  0x1d   : > { %10626 = sst [smem:[#allocation23_spill]] %s9353_s28  ;;  %p66_p0 = scmp.ne.s32.totalorder %s9341_s25, %s9337_s24 }
  0x1e   : > { %p9515_p1 = scmp.eq.s32.totalorder %s7523_s14, 0  ;;  %p301_p2 = scmp.ne.s32.totalorder %s9333_s23, %s9329_s22 }
  0x1f   : > { %p302_p3 = scmp.eq.s32.totalorder %s7523_s14, 3  ;;  %p307_p5 = scmp.ne.s32.totalorder %s9329_s22, %s9325_s21 }
  0x20   : > { %s10627_s16 = scalar_select %p9515_p1, 1, 0 }
  0x21   : > { %p9523_p4 = por %p9515_p1, %p66_p0  ;;  %p9529_p6 = por %p302_p3, %p301_p2 }
  0x22   : > { %p308_p7 = scmp.eq.s32.totalorder %s7524_s15, 3  ;;  %p7525_p8 = scmp.ge.s32.totalorder %s9365_s13, 1 }
  0x23   : > { %s10628_s17 = scalar_select %p9523_p4, 1, 0 }
  0x24   : > { %s10629_s18 = scalar_select %p9529_p6, 1, 0 }
  0x25   : > { %p343_p9 = scmp.lt.s32.totalorder %s9365_s13, 5  ;;  %p9535_p10 = por %p308_p7, %p307_p5 }
  0x26   : > { %10630 = sst [smem:[#allocation24_spill]] %s10629_s18  ;;  %s9367_s24 = smov [#allocation7]  }
  0x27   : > { %s10631_s19 = scalar_select %p9535_p10, 1, 0 }
  0x28   : > { %p9539_p11 = pnand %p7525_p8, %p343_p9  ;;  %s355_s14 = sshll.u32 %s9367_s24, 4  ;;  %s356_s14 = int_to_ptr.vmem [resolvable:$true] %s355_s14 }
  0x29   : > { %10632 = sst [smem:[#allocation25_spill]] %s10631_s19  ;;  %s9368_s15 = smov [#allocation10]  }
  0x2a   : > { %s10633_s20 = scalar_select %p9539_p11, 1, 0 }
  0x2b   : > { %p8896_p12 = pneg %p9539_p11  ;;  %s387_s11 = sshll.u32 %s9368_s15, 4  ;;  %s9551_s11 = int_to_ptr.vmem [resolvable:$true] %s387_s11 }
  0x2c   : > { %s10635_s1 = sld [smem:[#allocation27_spill]] }
  0x2d   : > { %p9547_p13 = pnand %p8896_p12, %p9515_p1 }
  0x2f   : > { %p9561_p2 = pneg %p9547_p13 }
  0x32   : > { %s9061_s9 = scalar_lea.hbm %s10635_s1, 512 }
  0x33   : > { %p9062_p0 = scmp.ne.s32.totalorder %s10635_s1, %s9061_s9  ;;  %p9068_p7 = scmp.lt.u32.totalorder %s9061_s9, %s10635_s1 }
  0x35   : > { %p9064_p3 = pnand %p9561_p2, %p9062_p0 }
  0x37   : > { %p9065_p5 = pneg %p9064_p3 }
  0x39   : > { %p9070_p8 = pnand %p9068_p7, %p9065_p5 }
  0x3b   : > { %9073 = shalt.err (!%p9070_p8)
}
  0x3c   : > { %s9074_s10 = scalar_lea.vmem %s356_s14, 512  ;;  %p9082_p6 = scmp.lt.s32.totalorder %s356_s14, %s356_s14 }
  0x3d   : > { %p9075_p9 = scmp.ne.s32.totalorder %s356_s14, %s9074_s10  ;;  %p9083_p1 = scmp.lt.s32.totalorder %s9074_s10, %s9074_s10 }
  0x3f   : > { %p9077_p12 = pnand %p9075_p9, %p9561_p2  ;;  %p9084_p4 = por %p9083_p1, %p9082_p6 }
  0x41   : > { %p9078_p10 = pneg %p9077_p12 }
  0x43   : > { %p9085_p11 = pnand %p9084_p4, %p9078_p10 }
  0x45   : > { %9088 = shalt.err (!%p9085_p11)
}
  0x46   : > { %s10608_s12 = smov 128   ;;  %s10609_s18 = smov 8  }
  0x47   : > { %8899 = dma.hbm_to_vmem [thread:$0]  (!%p9547_p13), %s10635_s1, 512, %s356_s14, [#allocation8], %s10608_s12, %s10608_s12, %s10609_s18  }
  0x48   : > { %s10637_s5 = sld [smem:[#allocation31_spill]] }
  0x4e   : > { %s9089_s8 = scalar_lea.hbm %s10637_s5, 512 }
  0x4f   : > { %p9090_p1 = scmp.ne.s32.totalorder %s10637_s5, %s9089_s8  ;;  %p9096_p10 = scmp.lt.u32.totalorder %s9089_s8, %s10637_s5 }
  0x51   : > { %p9092_p4 = pnand %p9090_p1, %p9561_p2 }
  0x53   : > { %p9093_p6 = pneg %p9092_p4 }
  0x55   : > { %p9098_p11 = pnand %p9096_p10, %p9093_p6 }
  0x57   : > { %9101 = shalt.err (!%p9098_p11)
}
  0x58   : > { %s9102_s14 = scalar_lea.vmem %s9551_s11, 512  ;;  %p9110_p7 = scmp.lt.s32.totalorder %s9551_s11, %s9551_s11 }
  0x59   : > { %p9103_p0 = scmp.ne.s32.totalorder %s9551_s11, %s9102_s14  ;;  %p9111_p8 = scmp.lt.s32.totalorder %s9102_s14, %s9102_s14 }
  0x5b   : > { %p9105_p3 = pnand %p9103_p0, %p9561_p2  ;;  %p9112_p9 = por %p9111_p8, %p9110_p7 }
  0x5d   : > { %p9106_p5 = pneg %p9105_p3 }
  0x5f   : > { %p9113_p12 = pnand %p9112_p9, %p9106_p5 }
  0x61   : > { %9116 = shalt.err (!%p9113_p12)
}
  0x62   : > { %8905 = dma.hbm_to_vmem [thread:$0]  (!%p9547_p13), %s10637_s5, 512, %s9551_s11, [#allocation11], %s10608_s12, %s10608_s12, %s10609_s18  }
  0x63   : > { %s9371_s6 = smov [#allocation9]   ;;  %s9372_s9 = smov [#allocation12]  }
  0x64   : > { %s371_s8 = sshll.u32 %s9371_s6, 4  ;;  %s403_s28 = sshll.u32 %s9372_s9, 4  ;;  %s372_s8 = int_to_ptr.vmem [resolvable:$true] %s371_s8  ;;  %s404_s28 = int_to_ptr.vmem [resolvable:$true] %s403_s28 }
  0x65   : > { %s10638_s3 = sld [smem:[#allocation29_spill]] }
  0x6b   : > { %s9117_s10 = scalar_lea.hbm %s10638_s3, 512 }
  0x6c   : > { %p9118_p1 = scmp.ne.s32.totalorder %s10638_s3, %s9117_s10  ;;  %p9124_p10 = scmp.lt.u32.totalorder %s9117_s10, %s10638_s3 }
  0x6e   : > { %p9120_p4 = pnand %p9118_p1, %p9561_p2 }
  0x70   : > { %p9121_p6 = pneg %p9120_p4 }
  0x72   : > { %p9126_p11 = pnand %p9124_p10, %p9121_p6 }
  0x74   : > { %9129 = shalt.err (!%p9126_p11)
}
  0x75   : > { %s9130_s11 = scalar_lea.vmem %s372_s8, 512  ;;  %p9138_p7 = scmp.lt.s32.totalorder %s372_s8, %s372_s8 }
  0x76   : > { %p9131_p0 = scmp.ne.s32.totalorder %s372_s8, %s9130_s11  ;;  %p9139_p8 = scmp.lt.s32.totalorder %s9130_s11, %s9130_s11 }
  0x78   : > { %p9133_p3 = pnand %p9131_p0, %p9561_p2  ;;  %p9140_p9 = por %p9139_p8, %p9138_p7 }
  0x7a   : > { %p9134_p5 = pneg %p9133_p3 }
  0x7c   : > { %p9141_p12 = pnand %p9140_p9, %p9134_p5 }
  0x7e   : > { %9144 = shalt.err (!%p9141_p12)
}
  0x7f   : > { %8902 = dma.hbm_to_vmem [thread:$0]  (!%p9547_p13), %s10638_s3, 512, %s372_s8, [#allocation8], %s10608_s12, %s10608_s12, %s10609_s18  }
  0x80   : > { %s10639_s7 = sld [smem:[#allocation33_spill]] }
  0x86   : > { %s9145_s9 = scalar_lea.hbm %s10639_s7, 512 }
  0x87   : > { %p9146_p1 = scmp.ne.s32.totalorder %s10639_s7, %s9145_s9  ;;  %p9152_p10 = scmp.lt.u32.totalorder %s9145_s9, %s10639_s7 }
  0x89   : > { %p9148_p4 = pnand %p9146_p1, %p9561_p2 }
  0x8b   : > { %p9149_p6 = pneg %p9148_p4 }
  0x8d   : > { %p9154_p11 = pnand %p9152_p10, %p9149_p6 }
  0x8f   : > { %9157 = shalt.err (!%p9154_p11)
}
  0x90   : > { %s9158_s2 = scalar_lea.vmem %s404_s28, 512  ;;  %p9166_p7 = scmp.lt.s32.totalorder %s404_s28, %s404_s28 }
  0x91   : > { %p9159_p0 = scmp.ne.s32.totalorder %s404_s28, %s9158_s2  ;;  %p9167_p8 = scmp.lt.s32.totalorder %s9158_s2, %s9158_s2 }
  0x93   : > { %p9161_p3 = pnand %p9159_p0, %p9561_p2  ;;  %p9168_p9 = por %p9167_p8, %p9166_p7 }
  0x95   : > { %p9162_p5 = pneg %p9161_p3 }
  0x97   : > { %p9169_p12 = pnand %p9168_p9, %p9162_p5 }
  0x99   : > { %9172 = shalt.err (!%p9169_p12)
}
  0x9a   : > { %8908 = dma.hbm_to_vmem [thread:$0]  (!%p9547_p13), %s10639_s7, 512, %s404_s28, [#allocation11], %s10608_s12, %s10608_s12, %s10609_s18  }
  0x9b   : > { %s43_s21 = sadd.s32 1, %s9357_s29  ;;  %s46_s24 = sadd.s32 1, %s9361_s30 }
  0x9c   : > { %p44_p2 = scmp.ge.s32.totalorder %s43_s21, 2  ;;  %s53_s1 = sadd.s32 1, %s9345_s26 }
  0x9d   : > { %p60_p1 = scmp.ne.s32.totalorder %s9345_s26, %s9341_s25  ;;  %p61_p4 = scmp.eq.s32.totalorder %s9365_s13, 0 }
  0x9e   : > { %s10679_s21 = smov (%p44_p2, %s43_s21), 0  ;;  %s10681_s24 = smov (!%p44_p2, %s46_s24), %s9361_s30 }
  0x9f   : > { %s287_s27 = ssub.s32 %s9357_s29, %s10679_s21  ;;  %p48_p6 = scmp.ge.s32.totalorder %s10681_s24, 2 }
  0xa0   : > { %s291_s4 = sadd.s32 1, %s9333_s23  ;;  %p9660_p10 = por %p61_p4, %p60_p1 }
  0xa1   : > { %p8924_p13 = scmp.lt.s32.totalorder %s9365_s13, 4  ;;  %s10683_s24 = smov (%p48_p6, %s10681_s24), 0 }
  0xa2   : > { %s426_s6 = sand.u32 1, %s9345_s26   ;;  %s7570_s9 = sshll.u32 %s9361_s30, 8 }
  0xa3   : > { %s50_s19 = ssub.s32 %s9361_s30, %s10683_s24  ;;  %s7531_s10 = sshll.u32 %s426_s6, 4 }
  0xa4   : > { %p51_p11 = scmp.eq.s32.totalorder %s50_s19, 0  ;;  %s288_s15 = sor.u32 %s287_s27, %s50_s19 }
  0xa5   : > { %p289_p0 = scmp.eq.s32.totalorder %s288_s15, 0  ;;  %s10641_s0 = sld [smem:[#allocation26_spill]] }
  0xa6   : > { %s9672_s14 = scalar_select %p51_p11, %s9345_s26, %s53_s1  }
  0xa7   : > { %s9675_s2 = scalar_select %p289_p0, %s9333_s23, %s291_s4  }
  0xa8   : > { %s430_s18 = scalar_lea.vmem [#allocation4], %s7531_s10  ;;  %p9686_p3 = pnand %p8924_p13, %p9660_p10 }
  0xa9   : > { %s437_s3 = sshll.u32 %s430_s18, 4  ;;  %s9692_s1 = scalar_lea.sflag [#allocation5], %s426_s6  ;;  %s9690_s3 = int_to_ptr.vmem [resolvable:$true] %s437_s3 }
  0xaa   : > { %p9175_p7 = pneg %p9686_p3 }
  0xab   : > { %s9680_s12 = scalar_lea.hbm %s10641_s0, %s7570_s9  ;;  %s9178_s9 = scalar_lea.hbm %s10641_s0, 512 }
  0xac   : > { %s9173_s4 = scalar_lea.hbm %s9680_s12, 256  ;;  %p9179_p12 = scmp.lt.u32.totalorder %s9680_s12, %s10641_s0 }
  0xad   : > { %p9174_p5 = scmp.ne.s32.totalorder %s9680_s12, %s9173_s4  ;;  %p9180_p2 = scmp.lt.u32.totalorder %s9178_s9, %s9173_s4 }
  0xae   : > { %p9182_p4 = scmp.lt.u32.totalorder %s9173_s4, %s9680_s12 }
  0xaf   : > { %p9176_p8 = pnand %p9175_p7, %p9174_p5  ;;  %p9181_p1 = por %p9180_p2, %p9179_p12 }
  0xb1   : > { %p9177_p9 = pneg %p9176_p8  ;;  %p9183_p6 = por %p9182_p4, %p9181_p1 }
  0xb3   : > { %p9184_p10 = pnand %p9183_p6, %p9177_p9 }
  0xb5   : > { %9187 = shalt.err (!%p9184_p10)
}
  0xb6   : > { %s9188_s6 = scalar_lea.vmem %s9690_s3, 256  ;;  %s9373_s10 = smov [#allocation4]  }
  0xb7   : > { %p9189_p13 = scmp.ne.s32.totalorder %s9690_s3, %s9188_s6  ;;  %s9193_s8 = sshll.u32 %s9373_s10, 4  ;;  %s9194_s8 = int_to_ptr.vmem [resolvable:$false] %s9193_s8 }
  0xb8   : > { %s9195_s11 = scalar_lea.vmem %s9194_s8, 512  ;;  %p9196_p5 = scmp.lt.s32.totalorder %s9690_s3, %s9194_s8 }
  0xb9   : > { %p9191_p11 = pnand %p9189_p13, %p9175_p7  ;;  %p9197_p8 = scmp.lt.s32.totalorder %s9195_s11, %s9188_s6 }
  0xbb   : > { %p9192_p0 = pneg %p9191_p11  ;;  %p9198_p12 = por %p9197_p8, %p9196_p5 }
  0xbd   : > { %p9199_p2 = pnand %p9198_p12, %p9192_p0 }
  0xbf   : > { %9202 = shalt.err (!%p9199_p2)
}
  0xc0   : > { %s10643_s4 = smov 8   ;;  %s10644_s18 = smov 128  }
  0xc1   : > { %8912 = dma.hbm_to_vmem [thread:$0]  (!%p9686_p3), %s9680_s12, 256, %s9690_s3, %s9692_s1, %s10644_s18, %s10644_s18, %s10643_s4  }
  0xc2   : > { %p10645_p7 = scmp.ne.s32.totalorder %s10633_s20, 0 }
  0xc3   : > { %s451_s28 = sand.u32 (!%p10645_p7), 1, %s9341_s25   ;;  %p10646_p9 = scmp.ne.s32.totalorder (!%p10645_p7), %s10628_s17, 0 }
  0xc4   : > { %449 = sbr.rel (%p10645_p7) target bundleno = 2706 (0xa92), region = 64  ;;  %s7535_s9 = sshll.u32 (!%p10645_p7), %s451_s28, 4 }
  0xc5   : > { %s452_s19 = scalar_lea.sflag (!%p10645_p7), [#allocation5], %s451_s28  ;;  %s9726_s15 = scalar_lea.vmem (!%p10645_p7), [#allocation4], %s7535_s9 }
  0xcb   : > { %9304 = dma.done.wait (%p10646_p9), %s452_s19, 256  }
  0xcc   : > { %9306 = vsyncadd (%p10646_p9), %s452_s19, 4294967040  ;;  %p10647_p1 = scmp.ne.s32.totalorder %s10627_s16, 0 }
  0xce   : > { %9308 = dma.done.wait (%p10647_p1), [#allocation8], 1024  }
  0xcf   : > { %9310 = vsyncadd (%p10647_p1), [#allocation8], 4294966272 }
  0xd0   : > { %9312 = dma.done.wait (%p10647_p1), [#allocation11], 1024  }
  0xd1   : > { %9314 = vsyncadd (%p10647_p1), [#allocation11], 4294966272  ;;  %s9741_s3 = sand.u32 1, %s9329_s22   ;;  %s10648_s1 = sld [smem:[#allocation22_spill]] }
  0xd2   : > { %s7540_s20 = sshll.u32 %s9741_s3, 3  ;;  %s7541_s17 = sshll.u32 %s9741_s3, 5 }
  0xd3   : > { %s9745_s12 = scalar_lea.vmem [#allocation13], %s7540_s20  ;;  %s9747_s27 = scalar_lea.vmem [#allocation14], %s7541_s17 }
  0xd7   : > { %p7542_p3 = scmp.ne.s32.totalorder %s10648_s1, 0 }
  0xd8   : > { %v523_v0 = vld [vmem:[#allocation9] sm:$0xff] (!%p7542_p3)  ;;  %v524_v1 = vld [vmem:[#allocation9 + $0x8] sm:$0xff] (!%p7542_p3)  ;;  %vm534_vm0 = vcmask (!%p7542_p3), 261120   ;;  %v525_v7 = vld [vmem:[#allocation9 + $0x10] sm:$0xff] (!%p7542_p3)  ;;  %s10649_s10 = sld [smem:[#allocation30_spill]] (!%p7542_p3)  ;;  %s9374_s8 = smov (!%p7542_p3), 112  }
  0xd9   : > { %520 = sbr.rel (%p7542_p3) target bundleno = 655 (0x28f), region = 88  ;;  %v1069_v2 = vld [vmem:[#allocation10] sm:$0xff] (!%p7542_p3)  ;;  %v542_v3 = vand.u32 (!%p7542_p3), 4294901760, %v523_v0  ;;  %v545_v4 = vand.u32 (!%p7542_p3), 4294901760, %v524_v1  ;;  %v1070_v5 = vld [vmem:[#allocation10 + $0x8] sm:$0xff] (!%p7542_p3)  ;;  %v526_v8 = vld [vmem:[#allocation9 + $0x18] sm:$0xff] (!%p7542_p3) }
  0xda   : > { %v1081_v6 = vand.u32 (!%p7542_p3), 4294901760, %v1069_v2  ;;  %v1084_v9 = vand.u32 (!%p7542_p3), 4294901760, %v1070_v5  ;;  %v548_v10 = vand.u32 (!%p7542_p3), 4294901760, %v525_v7  ;;  %v551_v11 = vand.u32 (!%p7542_p3), 4294901760, %v526_v8  ;;  %v1071_v12 = vld [vmem:[#allocation10 + $0x10] sm:$0xff] (!%p7542_p3)  ;;  %v1072_v13 = vld [vmem:[#allocation10 + $0x18] sm:$0xff] (!%p7542_p3) }
  0xdb   : > { %v521_v14 = vld [vmem:[%s9726_s15] sm:$0xff] (!%p7542_p3)  ;;  %v9751_v15 = vpack.c.bf16 (!%p7542_p3), %v545_v4, %v542_v3  ;;  %v1087_v16 = vand.u32 (!%p7542_p3), 4294901760, %v1071_v12  ;;  %v1090_v17 = vand.u32 (!%p7542_p3), 4294901760, %v1072_v13  ;;  %v522_v18 = vld [vmem:[%s9726_s15 + $0x8] sm:$0xff] (!%p7542_p3)  ;;  %v9767_v26 = vsub.f32 (!%p7542_p3), %v523_v0, %v542_v3  ;;  %s9375_s11 = smov (!%p7542_p3), 120   ;;  %s10650_s28 = sld [smem:[#allocation32_spill]] (!%p7542_p3) }
  0xdc   : > { %v536_v19 = vsel (!%p7542_p3), %vm534_vm0, %v521_v14, 0  ;;  %v9755_v20 = vpack.c.bf16 (!%p7542_p3), %v1084_v9, %v1081_v6  ;;  %v9757_v21 = vpack.c.bf16 (!%p7542_p3), %v551_v11, %v548_v10  ;;  %v539_v22 = vsel (!%p7542_p3), %vm534_vm0, %v522_v18, 0  ;;  %s9376_s9 = smov (!%p7542_p3), 104  }
  0xdd   : > { %v9760_v23 = vand.u32 (!%p7542_p3), 4294901760, %v536_v19  ;;  %8448 = vmatprep.subr.bf16.mxu0 (!%p7542_p3), %v9751_v15  ;;  %v9763_v24 = vpack.c.bf16 (!%p7542_p3), %v1090_v17, %v1087_v16  ;;  %v9765_v25 = vand.u32 (!%p7542_p3), 4294901760, %v539_v22  ;;  %v9769_v27 = vsub.f32 (!%p7542_p3), %v524_v1, %v545_v4 }
  0xde   : > { %8496 = vmatprep.subr.bf16.mxu1 (!%p7542_p3), %v9755_v20  ;;  %8450 = vmatpush3.bf16.msra.mxu0 (!%p7542_p3), %v9751_v15  ;;  %v9776_v29 = vsub.f32 (!%p7542_p3), %v1069_v2, %v1081_v6  ;;  %v9778_v30 = vsub.f32 (!%p7542_p3), %v1070_v5, %v1084_v9  ;;  %v633_v32 = vand.u32 (!%p7542_p3), 4294901760, %v9767_v26  ;;  %v9787_v34 = vsub.f32 (!%p7542_p3), %v525_v7, %v548_v10  ;;  %v7543_v14 = vld [vmem:[%s10649_s10] ss:$0 sm:$0xff] (!%p7542_p3) }
  0xdf   : > { %v9774_v28 = vsub.f32 (!%p7542_p3), %v536_v19, %v9760_v23  ;;  %8498 = vmatpush3.bf16.msra.mxu1 (!%p7542_p3), %v9755_v20  ;;  %8452 = vmatprep.subr.bf16.mxu0 (!%p7542_p3), %v9757_v21  ;;  %v9783_v31 = vsub.f32 (!%p7542_p3), %v539_v22, %v9765_v25  ;;  %v640_v33 = vand.u32 (!%p7542_p3), 4294901760, %v9769_v27  ;;  %v9795_v38 = vsub.f32 (!%p7542_p3), %v526_v8, %v551_v11 }
  0xe0   : > { %8500 = vmatprep.subr.bf16.mxu1 %v9763_v24  ;;  %v1172_v36 = vand.u32 4294901760, %v9776_v29  ;;  %v1179_v37 = vand.u32 4294901760, %v9778_v30  ;;  %v634_v40 = vsub.f32 %v9767_v26, %v633_v32  ;;  %v647_v42 = vand.u32 4294901760, %v9787_v34 }
  0xe1   : > { %v9791_v35 = vand.u32 4294901760, %v9774_v28  ;;  %v9798_v39 = vand.u32 4294901760, %v9783_v31  ;;  %v641_v41 = vsub.f32 %v9769_v27, %v640_v33  ;;  %v654_v46 = vand.u32 4294901760, %v9795_v38 }
  0xe2   : > { %8454 = vmatpush3.bf16.msra.mxu0 %v9757_v21  ;;  %v1173_v44 = vsub.f32 %v9776_v29, %v1172_v36  ;;  %v1180_v45 = vsub.f32 %v9778_v30, %v1179_v37  ;;  %v635_v48 = vand.u32 4294901760, %v634_v40  ;;  %v648_v50 = vsub.f32 %v9787_v34, %v647_v42 }
  0xe3   : > { %v613_v43 = vsub.f32 %v9774_v28, %v9791_v35  ;;  %8502 = vmatpush3.bf16.msra.mxu1 %v9763_v24  ;;  %v623_v47 = vsub.f32 %v9783_v31, %v9798_v39  ;;  %v642_v49 = vand.u32 4294901760, %v641_v41  ;;  %v655_v54 = vsub.f32 %v9795_v38, %v654_v46 }
  0xe4   : > { %v1174_v52 = vand.u32 4294901760, %v1173_v44  ;;  %v1181_v53 = vand.u32 4294901760, %v1180_v45  ;;  %v649_v57 = vand.u32 4294901760, %v648_v50  ;;  %v9826_v58 = vsub.f32 %v1071_v12, %v1087_v16 }
  0xe5   : > { %v614_v51 = vand.u32 4294901760, %v613_v43  ;;  %v624_v55 = vand.u32 4294901760, %v623_v47  ;;  %v8455_v56 = vpack.c.bf16 %v642_v49, %v635_v48  ;;  %v656_v60 = vand.u32 4294901760, %v655_v54 }
  0xe6   : > { %v8503_v59 = vpack.c.bf16 %v1181_v53, %v1174_v52  ;;  %v1192_v61 = vsub.f32 %v1072_v13, %v1090_v17  ;;  %v1186_v62 = vand.u32 4294901760, %v9826_v58  ;;  %v8463_v3 = vpack.c.bf16 %v9769_v27, %v9767_v26 }
  0xe7   : > { %7855 = vmatprep.mubr.f32.mxu0 %v614_v51  ;;  %7921 = vmatprep.mubr.f32.mxu1 %v614_v51  ;;  %v8459_v63 = vpack.c.bf16 %v656_v60, %v649_v57  ;;  %v8511_v7 = vpack.c.bf16 %v9778_v30, %v9776_v29  ;;  %v8467_v8 = vpack.c.bf16 %v9795_v38, %v9787_v34  ;;  %v1633_v26 = vlaneseq }
  0xe8   : > { %7856 = vmatmul.mubr.f32.vlgmr.msra.gmra.mrb[0].mxu0 %v624_v55  ;;  %8456 = vmatprep.subr.bf16.mxu0 %v8455_v56  ;;  %v1193_v0 = vand.u32 4294901760, %v1192_v61  ;;  %v1187_v1 = vsub.f32 %v9826_v58, %v1186_v62  ;;  %v8515_v9 = vpack.c.bf16 %v1192_v61, %v9826_v58  ;;  %v8479_v10 = vpack.c.bf16 %v640_v33, %v633_v32 }
  0xe9   : > { %7922 = vmatmul.mubr.f32.vlgmr.msra.gmra.mrb[0].mxu1 %v624_v55  ;;  %8504 = vmatprep.subr.bf16.mxu1 %v8503_v59  ;;  %v8527_v11 = vpack.c.bf16 %v1179_v37, %v1172_v36  ;;  %v8483_v12 = vpack.c.bf16 %v654_v46, %v647_v42  ;;  %v9378_v27 = vmov 1934713408   ;;  %v1634_v30 = vshrl.u32 %v1633_v26, 7 }
  0xea   : > { %8458 = vmatpush3.bf16.msra.mxu0 %v8455_v56  ;;  %8506 = vmatpush3.bf16.msra.mxu1 %v8503_v59  ;;  %v1194_v2 = vsub.f32 %v1192_v61, %v1193_v0  ;;  %v1188_v4 = vand.u32 4294901760, %v1187_v1  ;;  %v8531_v13 = vpack.c.bf16 %v1193_v0, %v1186_v62  ;;  %vm1900_vm1 = vcmask 64512  }
  0xeb   : > { %8460 = vmatprep.subr.bf16.mxu0 %v8459_v63  ;;  %7866 = vmatprep.mubr.f32.mxu0 %v9760_v23 }
  0xec   : > { %7932 = vmatprep.mubr.f32.mxu1 %v9760_v23  ;;  %v1195_v5 = vand.u32 4294901760, %v1194_v2 }
  0xee   : > { %8462 = vmatpush3.bf16.msra.mxu0 %v8459_v63  ;;  %v8507_v6 = vpack.c.bf16 %v1195_v5, %v1188_v4 }
  0xef   : > { %8464 = vmatprep.subr.bf16.mxu0 %v8463_v3 }
  0xf0   : > { %8508 = vmatprep.subr.bf16.mxu1 %v8507_v6 }
  0xf1   : > { %7867 = vmatmul.mubr.f32.vlgmr.msra.gmra.mrb[0].mxu0 %v9765_v25  ;;  %8510 = vmatpush3.bf16.msra.mxu1 %v8507_v6 }
  0xf2   : > { %8466 = vmatpush3.bf16.msra.mxu0 %v8463_v3  ;;  %8512 = vmatprep.subr.bf16.mxu1 %v8511_v7 }
  0xf3   : > { %8468 = vmatprep.subr.bf16.mxu0 %v8467_v8  ;;  %7877 = vmatprep.mubr.f32.mxu0 %v9774_v28 }
  0xf4   : > { %7933 = vmatmul.mubr.f32.vlgmr.msra.gmra.mrb[0].mxu1 %v9765_v25 }
  0xf5   : > { %8514 = vmatpush3.bf16.msra.mxu1 %v8511_v7  ;;  %7943 = vmatprep.mubr.f32.mxu1 %v9774_v28  ;;  %v1663_v28 = vunpack.c.l.s4 %v9378_v27 }
  0xf6   : > { %8470 = vmatpush3.bf16.msra.mxu0 %v8467_v8  ;;  %8516 = vmatprep.subr.bf16.mxu1 %v8515_v9 }
  0xf7   : > { %8472 = vmatprep.subr.bf16.mxu0 %v9751_v15  ;;  %v1664_v33 = vunpack.c.0.s8 %v1663_v28 }
  0xf9   : > { %7878 = vmatmul.mubr.f32.vlgmr.msra.gmra.mrb[0].mxu0 %v9783_v31  ;;  %8518 = vmatpush3.bf16.msra.mxu1 %v8515_v9  ;;  %v9903_v41 = vsub.s32 %v1664_v33, %v1634_v30 }
  0xfa   : > { %8474 = vmatpush3.bf16.msra.mxu0 %v9751_v15  ;;  %8520 = vmatprep.subr.bf16.mxu1 %v9755_v20 }
  0xfb   : > { %8476 = vmatprep.subr.bf16.mxu0 %v9757_v21  ;;  %7888 = vmatprep.mubr.f32.mxu0 %v9791_v35 }
  0xfc   : > { %7944 = vmatmul.mubr.f32.vlgmr.msra.gmra.mrb[0].mxu1 %v9783_v31 }
  0xfd   : > { %8522 = vmatpush3.bf16.msra.mxu1 %v9755_v20  ;;  %7954 = vmatprep.mubr.f32.mxu1 %v9791_v35 }
  0xfe   : > { %8478 = vmatpush3.bf16.msra.mxu0 %v9757_v21  ;;  %8524 = vmatprep.subr.bf16.mxu1 %v9763_v24 }
  0xff   : > { %8480 = vmatprep.subr.bf16.mxu0 %v8479_v10 }
 0x101   : > { %7889 = vmatmul.mubr.f32.vlgmr.msra.gmra.mrb[0].mxu0 %v9798_v39  ;;  %8526 = vmatpush3.bf16.msra.mxu1 %v9763_v24 }
 0x102   : > { %8482 = vmatpush3.bf16.msra.mxu0 %v8479_v10  ;;  %8528 = vmatprep.subr.bf16.mxu1 %v8527_v11 }
 0x103   : > { %8484 = vmatprep.subr.bf16.mxu0 %v8483_v12  ;;  %7899 = vmatprep.mubr.f32.mxu0 %v9760_v23 }
 0x104   : > { %7955 = vmatmul.mubr.f32.vlgmr.msra.gmra.mrb[0].mxu1 %v9798_v39 }
 0x105   : > { %8530 = vmatpush3.bf16.msra.mxu1 %v8527_v11  ;;  %7965 = vmatprep.mubr.f32.mxu1 %v9760_v23 }
 0x106   : > { %8486 = vmatpush3.bf16.msra.mxu0 %v8483_v12  ;;  %8532 = vmatprep.subr.bf16.mxu1 %v8531_v13 }
 0x107   : > { %8488 = vmatprep.subr.bf16.mxu0 %v9751_v15 }
 0x109   : > { %7900 = vmatmul.mubr.f32.vlgmr.msra.gmra.mrb[0].mxu0 %v9765_v25  ;;  %8534 = vmatpush3.bf16.msra.mxu1 %v8531_v13 }
 0x10a   : > { %8490 = vmatpush3.bf16.msra.mxu0 %v9751_v15  ;;  %8536 = vmatprep.subr.bf16.mxu1 %v9755_v20 }
 0x10b   : > { %8492 = vmatprep.subr.bf16.mxu0 %v9757_v21  ;;  %7910 = vmatprep.mubr.f32.mxu0 %v9760_v23 }
 0x10c   : > { %7966 = vmatmul.mubr.f32.vlgmr.msra.gmra.mrb[0].mxu1 %v9765_v25 }
 0x10d   : > { %8538 = vmatpush3.bf16.msra.mxu1 %v9755_v20  ;;  %7976 = vmatprep.mubr.f32.mxu1 %v9760_v23 }
 0x10e   : > { %8494 = vmatpush3.bf16.msra.mxu0 %v9757_v21  ;;  %8540 = vmatprep.subr.bf16.mxu1 %v9763_v24  ;;  %v7544_v21 = vld [vmem:[%s10650_s28] ss:$0 sm:$0xff] }
 0x111   : > { %7911 = vmatmul.mubr.f32.vlgmr.msra.gmra.mrb[0].mxu0 %v9765_v25  ;;  %8542 = vmatpush3.bf16.msra.mxu1 %v9763_v24  ;;  %v9377_v24 = vmov 1983009808  }
 0x114   : > { %7977 = vmatmul.mubr.f32.vlgmr.msra.gmra.mrb[0].mxu1 %v9765_v25  ;;  %v1631_v25 = vunpack.c.l.s4 %v9377_v24 }
 0x116   : > { %v1632_v29 = vunpack.c.0.s8 %v1631_v25 }
 0x118   : > { %v9901_v34 = vsub.s32 %v1632_v29, %v1634_v30 }
 0x1e4   : > { %v7912_v15 = vpop.f32.mrb[0].mxu0 }
 0x1e5   : > { %v8759_v16 = vadd.f32 %v7912_v15, %v7543_v14  ;;  %v1059_v17 = vpop.f32.mrb[1].mxu0 }
 0x1e6   : > { %v9888_v19 = vadd.f32 %v7543_v14, %v1059_v17 }
 0x1e7   : > { %1618 = vrot.lane.b32.xlu1 %v8759_v16, %s9374_s8  ;;  %1612 = vrot.lane.b32.xlu0 %v8759_v16, %s9375_s11  ;;  %v7978_v18 = vpop.f32.mrb[0].mxu1 }
 0x1e8   : > { %v1598_v20 = vpop.f32.mrb[1].mxu1  ;;  %v8761_v22 = vadd.f32 %v7978_v18, %v7544_v21 }
 0x1e9   : > { %v9895_v23 = vadd.f32 %v7544_v21, %v1598_v20 }
 0x1eb   : > { %1624 = vrot.lane.b32.xlu1 %v8759_v16, %s9376_s9  ;;  %1610 = vrot.lane.b32.xlu0 %v9888_v19, %s9375_s11 }
 0x1ef   : > { %1913 = vrot.lane.b32.xlu1 %v8761_v22, %s9375_s11  ;;  %1622 = vrot.lane.b32.xlu0 %v9888_v19, %s9376_s9 }
 0x1f3   : > { %1919 = vrot.lane.b32.xlu1 %v8761_v22, %s9374_s8  ;;  %1911 = vrot.lane.b32.xlu0 %v9895_v23, %s9375_s11 }
 0x1f7   : > { %1616 = vrot.lane.b32.xlu1 %v9888_v19, %s9374_s8  ;;  %1917 = vrot.lane.b32.xlu0 %v9895_v23, %s9374_s8 }
 0x1fb   : > { %1925 = vrot.lane.b32.xlu1 %v8761_v22, %s9376_s9  ;;  %1923 = vrot.lane.b32.xlu0 %v9895_v23, %s9376_s9 }
 0x259   : > { %v1619_v31 = vpop.permute.xlu1 %1618  ;;  %v1613_v32 = vpop.permute.xlu0 %1612 }
 0x25a   : > { %v1696_v35 = vcombine.low %v8759_v16, %v1619_v31  ;;  %v1697_v36 = vcombine.high %v8759_v16, %v1619_v31 }
 0x25c   : > { %v1704_v42 = vrot.slane %v1696_v35, %v9901_v34  ;;  %v1711_v43 = vrot.slane %v1697_v36, %v9901_v34 }
 0x25d   : > { %v1625_v37 = vpop.permute.xlu1 %1624  ;;  %v1611_v38 = vpop.permute.xlu0 %1610 }
 0x25e   : > { %v1712_v39 = vcombine.low %v1613_v32, %v1625_v37  ;;  %v1713_v40 = vcombine.high %v1613_v32, %v1625_v37 }
 0x260   : > { %v1720_v44 = vrot.slane %v1712_v39, %v9901_v34  ;;  %v1727_v45 = vrot.slane %v1713_v40, %v9901_v34 }
 0x261   : > { %v9909_v46 = vpop.permute.xlu1 %1913  ;;  %v1623_v47 = vpop.permute.xlu0 %1622 }
 0x262   : > { %v1728_v48 = vcombine.low %v1704_v42, %v1720_v44  ;;  %v1729_v49 = vcombine.high %v1704_v42, %v1720_v44  ;;  %v1744_v50 = vcombine.low %v1711_v43, %v1727_v45  ;;  %v1745_v51 = vcombine.high %v1711_v43, %v1727_v45 }
 0x263   : > { %v1644_v56 = vcombine.low %v1611_v38, %v1623_v47  ;;  %v1645_v57 = vcombine.high %v1611_v38, %v1623_v47 }
 0x264   : > { %v1736_v52 = vrot.slane %v1728_v48, %v9903_v41  ;;  %v1743_v53 = vrot.slane %v1729_v49, %v9903_v41  ;;  %v1752_v54 = vrot.slane %v1744_v50, %v9903_v41  ;;  %v1759_v55 = vrot.slane %v1745_v51, %v9903_v41 }
 0x265   : > { %v1920_v58 = vpop.permute.xlu1 %1919  ;;  %v1912_v59 = vpop.permute.xlu0 %1911  ;;  %v1652_v6 = vrot.slane %v1644_v56, %v9901_v34  ;;  %v1659_v7 = vrot.slane %v1645_v57, %v9901_v34 }
 0x266   : > { %v1832_v60 = vcombine.low %v1736_v52, %v1743_v53  ;;  %v7547_v61 = vcombine.high %v1736_v52, %v1743_v53  ;;  %v1848_v62 = vcombine.low %v1752_v54, %v1759_v55  ;;  %v7548_v63 = vcombine.high %v1752_v54, %v1759_v55 }
 0x267   : > { %v1997_v0 = vcombine.low %v8761_v22, %v1920_v58  ;;  %v1998_v1 = vcombine.high %v8761_v22, %v1920_v58 }
 0x268   : > { %v1839_v2 = vrot.slane %v1832_v60, %v9901_v34  ;;  %v1847_v3 = vrot.slane %v7547_v61, %v9901_v34  ;;  %v1855_v4 = vrot.slane %v1848_v62, %v9901_v34  ;;  %v1863_v5 = vrot.slane %v7548_v63, %v9901_v34 }
 0x269   : > { %v2005_v8 = vrot.slane %v1997_v0, %v9901_v34  ;;  %v2012_v9 = vrot.slane %v1998_v1, %v9901_v34  ;;  %v1617_v10 = vpop.permute.xlu1 %1616  ;;  %v1918_v11 = vpop.permute.xlu0 %1917 }
 0x26a   : > { %v1864_v12 = vcombine.low %v1839_v2, %v1847_v3  ;;  %v1865_v13 = vcombine.high %v1839_v2, %v1847_v3  ;;  %v1880_v14 = vcombine.low %v1855_v4, %v1863_v5  ;;  %v1881_v15 = vcombine.high %v1855_v4, %v1863_v5 }
 0x26b   : > { %v1628_v16 = vcombine.low %v9888_v19, %v1617_v10  ;;  %v1629_v17 = vcombine.high %v9888_v19, %v1617_v10  ;;  %v1929_v18 = vcombine.low %v9895_v23, %v1918_v11  ;;  %v1930_v20 = vcombine.high %v9895_v23, %v1918_v11 }
 0x26c   : > { %v1872_v21 = vrot.slane %v1864_v12, %v9903_v41  ;;  %v1879_v22 = vrot.slane %v1865_v13, %v9903_v41  ;;  %v1888_v24 = vrot.slane %v1880_v14, %v9903_v41  ;;  %v1895_v25 = vrot.slane %v1881_v15, %v9903_v41 }
 0x26d   : > { %v1636_v26 = vrot.slane %v1628_v16, %v9901_v34  ;;  %v1643_v27 = vrot.slane %v1629_v17, %v9901_v34  ;;  %v9934_v28 = vrot.slane %v1929_v18, %v9901_v34  ;;  %v9937_v19 = vrot.slane %v1930_v20, %v9901_v34  ;;  %v1926_v29 = vpop.permute.xlu1 %1925  ;;  %v1924_v23 = vpop.permute.xlu0 %1923 }
 0x26e   : > { %v1896_v30 = vcombine.low %v1872_v21, %v1888_v24  ;;  %v1897_v31 = vcombine.high %v1872_v21, %v1888_v24  ;;  %v1898_v32 = vcombine.low %v1879_v22, %v1895_v25  ;;  %v1899_v33 = vcombine.high %v1879_v22, %v1895_v25 }
 0x26f   : > { %v1660_v35 = vcombine.low %v1636_v26, %v1652_v6  ;;  %v1661_v36 = vcombine.high %v1636_v26, %v1652_v6  ;;  %v1676_v37 = vcombine.low %v1643_v27, %v1659_v7  ;;  %v1677_v38 = vcombine.high %v1643_v27, %v1659_v7 }
 0x270   : > { %1902 = vst.msk [vmem:[#allocation2 + $0x8] sm:$0xff] %vm1900_vm1, %v1896_v30  ;;  %1904 = vst.msk [vmem:[#allocation2 + $0x18] sm:$0xff] %vm1900_vm1, %v1897_v31  ;;  %v2013_v39 = vcombine.low %v9909_v46, %v1926_v29  ;;  %v2014_v40 = vcombine.high %v9909_v46, %v1926_v29  ;;  %v1945_v42 = vcombine.low %v1912_v59, %v1924_v23 }
 0x271   : > { %1906 = vst.msk [vmem:[#allocation2 + $0x28] sm:$0xff] %vm1900_vm1, %v1898_v32  ;;  %1908 = vst.msk [vmem:[#allocation2 + $0x38] sm:$0xff] %vm1900_vm1, %v1899_v33  ;;  %v1946_v43 = vcombine.high %v1912_v59, %v1924_v23  ;;  %v1668_v44 = vrot.slane %v1660_v35, %v9903_v41  ;;  %v1675_v45 = vrot.slane %v1661_v36, %v9903_v41 }
 0x272   : > { %v1684_v47 = vrot.slane %v1676_v37, %v9903_v41  ;;  %v1691_v48 = vrot.slane %v1677_v38, %v9903_v41  ;;  %v2021_v49 = vrot.slane %v2013_v39, %v9901_v34  ;;  %v2028_v50 = vrot.slane %v2014_v40, %v9901_v34 }
 0x273   : > { %v1953_v51 = vrot.slane %v1945_v42, %v9901_v34  ;;  %v1960_v52 = vrot.slane %v1946_v43, %v9901_v34  ;;  %v1764_v53 = vcombine.low %v1668_v44, %v1675_v45  ;;  %v7545_v46 = vcombine.high %v1668_v44, %v1675_v45 }
 0x274   : > { %v1780_v54 = vcombine.low %v1684_v47, %v1691_v48  ;;  %v7546_v55 = vcombine.high %v1684_v47, %v1691_v48  ;;  %v2029_v56 = vcombine.low %v2005_v8, %v2021_v49  ;;  %v2030_v57 = vcombine.high %v2005_v8, %v2021_v49 }
 0x275   : > { %v2045_v58 = vcombine.low %v2012_v9, %v2028_v50  ;;  %v2046_v59 = vcombine.high %v2012_v9, %v2028_v50  ;;  %v1771_v60 = vrot.slane %v1764_v53, %v9901_v34  ;;  %v1779_v61 = vrot.slane %v7545_v46, %v9901_v34 }
 0x276   : > { %v1787_v62 = vrot.slane %v1780_v54, %v9901_v34  ;;  %v1795_v63 = vrot.slane %v7546_v55, %v9901_v34  ;;  %v2037_v0 = vrot.slane %v2029_v56, %v9903_v41  ;;  %v2044_v1 = vrot.slane %v2030_v57, %v9903_v41 }
 0x277   : > { %v2053_v2 = vrot.slane %v2045_v58, %v9903_v41  ;;  %v2060_v3 = vrot.slane %v2046_v59, %v9903_v41  ;;  %v1796_v4 = vcombine.low %v1771_v60, %v1779_v61  ;;  %v1797_v5 = vcombine.high %v1771_v60, %v1779_v61 }
 0x278   : > { %v1812_v6 = vcombine.low %v1787_v62, %v1795_v63  ;;  %v1813_v7 = vcombine.high %v1787_v62, %v1795_v63  ;;  %v2133_v8 = vcombine.low %v2037_v0, %v2044_v1  ;;  %v7551_v9 = vcombine.high %v2037_v0, %v2044_v1 }
 0x279   : > { %v2149_v10 = vcombine.low %v2053_v2, %v2060_v3  ;;  %v7552_v11 = vcombine.high %v2053_v2, %v2060_v3  ;;  %v1804_v12 = vrot.slane %v1796_v4, %v9903_v41  ;;  %v1811_v13 = vrot.slane %v1797_v5, %v9903_v41 }
 0x27a   : > { %v1820_v14 = vrot.slane %v1812_v6, %v9903_v41  ;;  %v1827_v15 = vrot.slane %v1813_v7, %v9903_v41  ;;  %v2140_v16 = vrot.slane %v2133_v8, %v9901_v34  ;;  %v2148_v17 = vrot.slane %v7551_v9, %v9901_v34 }
 0x27b   : > { %v2156_v18 = vrot.slane %v2149_v10, %v9901_v34  ;;  %v2164_v20 = vrot.slane %v7552_v11, %v9901_v34  ;;  %v1961_v30 = vcombine.low %v9934_v28, %v1953_v51  ;;  %v1962_v31 = vcombine.high %v9934_v28, %v1953_v51 }
 0x27c   : > { %v1828_v21 = vcombine.low %v1804_v12, %v1820_v14  ;;  %v1829_v22 = vcombine.high %v1804_v12, %v1820_v14  ;;  %v1830_v24 = vcombine.low %v1811_v13, %v1827_v15  ;;  %v1831_v25 = vcombine.high %v1811_v13, %v1827_v15 }
 0x27d   : > { %v2165_v26 = vcombine.low %v2140_v16, %v2148_v17  ;;  %v2166_v27 = vcombine.high %v2140_v16, %v2148_v17  ;;  %v2181_v29 = vcombine.low %v2156_v18, %v2164_v20  ;;  %v2182_v23 = vcombine.high %v2156_v18, %v2164_v20 }
 0x27e   : > { %1901 = vst.msk [vmem:[#allocation2] sm:$0xff] %vm1900_vm1, %v1828_v21  ;;  %1903 = vst.msk [vmem:[#allocation2 + $0x10] sm:$0xff] %vm1900_vm1, %v1829_v22  ;;  %v1977_v32 = vcombine.low %v9937_v19, %v1960_v52  ;;  %v1978_v33 = vcombine.high %v9937_v19, %v1960_v52  ;;  %v1969_v39 = vrot.slane %v1961_v30, %v9903_v41 }
 0x27f   : > { %1905 = vst.msk [vmem:[#allocation2 + $0x20] sm:$0xff] %vm1900_vm1, %v1830_v24  ;;  %1907 = vst.msk [vmem:[#allocation2 + $0x30] sm:$0xff] %vm1900_vm1, %v1831_v25  ;;  %v2173_v35 = vrot.slane %v2165_v26, %v9903_v41  ;;  %v2180_v36 = vrot.slane %v2166_v27, %v9903_v41  ;;  %v2189_v37 = vrot.slane %v2181_v29, %v9903_v41 }
 0x280   : > { %v2196_v38 = vrot.slane %v2182_v23, %v9903_v41  ;;  %v1976_v40 = vrot.slane %v1962_v31, %v9903_v41  ;;  %v1985_v42 = vrot.slane %v1977_v32, %v9903_v41  ;;  %v1992_v28 = vrot.slane %v1978_v33, %v9903_v41 }
 0x281   : > { %v2197_v43 = vcombine.low %v2173_v35, %v2189_v37  ;;  %v2198_v44 = vcombine.high %v2173_v35, %v2189_v37 }
 0x282   : > { %v2199_v45 = vcombine.low %v2180_v36, %v2196_v38  ;;  %v2200_v19 = vcombine.high %v2180_v36, %v2196_v38  ;;  %v2065_v47 = vcombine.low %v1969_v39, %v1976_v40  ;;  %v7549_v48 = vcombine.high %v1969_v39, %v1976_v40 }
 0x283   : > { %v2081_v49 = vcombine.low %v1985_v42, %v1992_v28  ;;  %v7550_v50 = vcombine.high %v1985_v42, %v1992_v28  ;;  %2202 = vst.msk [vmem:[#allocation3 + $0x8] sm:$0xff] %vm1900_vm1, %v2197_v43  ;;  %2204 = vst.msk [vmem:[#allocation3 + $0x18] sm:$0xff] %vm1900_vm1, %v2198_v44 }
 0x284   : > { %2206 = vst.msk [vmem:[#allocation3 + $0x28] sm:$0xff] %vm1900_vm1, %v2199_v45  ;;  %2208 = vst.msk [vmem:[#allocation3 + $0x38] sm:$0xff] %vm1900_vm1, %v2200_v19  ;;  %v2072_v51 = vrot.slane %v2065_v47, %v9901_v34  ;;  %v2080_v52 = vrot.slane %v7549_v48, %v9901_v34 }
 0x285   : > { %v2088_v53 = vrot.slane %v2081_v49, %v9901_v34  ;;  %v2096_v46 = vrot.slane %v7550_v50, %v9901_v34 }
 0x286   : > { %v2097_v54 = vcombine.low %v2072_v51, %v2080_v52  ;;  %v2098_v55 = vcombine.high %v2072_v51, %v2080_v52 }
 0x287   : > { %v2113_v56 = vcombine.low %v2088_v53, %v2096_v46  ;;  %v2114_v57 = vcombine.high %v2088_v53, %v2096_v46 }
 0x288   : > { %v2105_v58 = vrot.slane %v2097_v54, %v9903_v41  ;;  %v2112_v59 = vrot.slane %v2098_v55, %v9903_v41 }
 0x289   : > { %v2121_v60 = vrot.slane %v2113_v56, %v9903_v41  ;;  %v2128_v61 = vrot.slane %v2114_v57, %v9903_v41 }
 0x28b   : > { %v2129_v62 = vcombine.low %v2105_v58, %v2121_v60  ;;  %v2130_v63 = vcombine.high %v2105_v58, %v2121_v60  ;;  %v2131_v0 = vcombine.low %v2112_v59, %v2128_v61  ;;  %v2132_v1 = vcombine.high %v2112_v59, %v2128_v61 }
 0x28d   : > { %2201 = vst.msk [vmem:[#allocation3] sm:$0xff] %vm1900_vm1, %v2129_v62  ;;  %2203 = vst.msk [vmem:[#allocation3 + $0x10] sm:$0xff] %vm1900_vm1, %v2130_v63 }
 0x28e   : > { %2205 = vst.msk [vmem:[#allocation3 + $0x20] sm:$0xff] %vm1900_vm1, %v2131_v0  ;;  %2207 = vst.msk [vmem:[#allocation3 + $0x30] sm:$0xff] %vm1900_vm1, %v2132_v1 }
 0x28f PF: > { %v2212_v34 = vld [vmem:[#allocation7] sm:$0xff]  ;;  %s10651_s19 = sld [smem:[#allocation22_spill]]  ;;  %v2213_v2 = vld [vmem:[#allocation7 + $0x8] sm:$0xff]  ;;  %v2214_v3 = vld [vmem:[#allocation7 + $0x10] sm:$0xff]  ;;  %v9379_v4 = vmov 0.0|0.0   ;;  %vm9380_vm2 = vmmov 0  }
 0x290   : > { %8543 = vmatprep.subr.bf16.mxu0 %v9379_v4  ;;  %v2228_v41 = vand.u32 4294901760, %v2212_v34  ;;  %v2231_v5 = vand.u32 4294901760, %v2213_v2  ;;  %v2215_v6 = vld [vmem:[#allocation7 + $0x18] sm:$0xff]  ;;  %v2234_v7 = vand.u32 4294901760, %v2214_v3  ;;  %v9381_v8 = vmov 0.0   ;;  %8579 = vmatprep.subr.bf16.mxu1 %v9379_v4  ;;  %s10652_s16 = sld [smem:[#allocation28_spill]] }
 0x291   : > { %7987 = vmatprep.mubr.msk.f32.mxu0 %vm9380_vm2, %v9381_v8  ;;  %vm2223_vm3 = vcmask 261120   ;;  %v2237_v9 = vand.u32 4294901760, %v2215_v6  ;;  %8049 = vmatprep.mubr.msk.f32.mxu1 %vm9380_vm2, %v9381_v8  ;;  %s9382_s6 = smov 104   ;;  %s9383_s10 = smov 120   ;;  %v2859_v49 = vld [vmem:[#allocation2] sm:$0xff]  ;;  %v2860_v50 = vld [vmem:[#allocation2 + $0x8] sm:$0xff] }
 0x292   : > { %v8544_v10 = vpack.c.bf16 %v2231_v5, %v2228_v41  ;;  %v2308_v11 = vsub.f32 %v2212_v34, %v2228_v41  ;;  %v2315_v12 = vsub.f32 %v2213_v2, %v2231_v5  ;;  %v2322_v13 = vsub.f32 %v2214_v3, %v2234_v7  ;;  %s9384_s8 = smov 112   ;;  %v2861_v51 = vld [vmem:[#allocation2 + $0x10] sm:$0xff]  ;;  %v2862_v46 = vld [vmem:[#allocation2 + $0x18] sm:$0xff]  ;;  %s9387_s11 = smov 16  }
 0x293   : > { %v8547_v15 = vpack.c.bf16 %v2237_v9, %v2234_v7  ;;  %v2329_v16 = vsub.f32 %v2215_v6, %v2237_v9  ;;  %vm2875_vm4 = vcmask 64512   ;;  %vm4748_vm5 = vcmask 130048   ;;  %s10610_s4 = smov 8   ;;  %s9389_s18 = smov 24  }
 0x294   : > { %8545 = vmatpush3.bf16.msra.mxu0 %v8544_v10  ;;  %v2309_v20 = vand.u32 4294901760, %v2308_v11  ;;  %v2316_v21 = vand.u32 4294901760, %v2315_v12  ;;  %v2323_v22 = vand.u32 4294901760, %v2322_v13  ;;  %v8556_v40 = vpack.c.bf16 %v2315_v12, %v2308_v11  ;;  %s10655_s1 = sld [smem:[#allocation24_spill]]  ;;  %s7334_s9 = scalar_lea.sflag [#allocation15], %s9741_s3 }
 0x295   : > { %s7553_s20 = sshll.u32 %s10651_s19, 3  ;;  %8546 = vmatprep.subr.bf16.mxu0 %v9379_v4  ;;  %v2330_v24 = vand.u32 4294901760, %v2329_v16  ;;  %v8559_v42 = vpack.c.bf16 %v2329_v16, %v2322_v13  ;;  %v2880_v52 = vsel %vm2875_vm4, %v2859_v49, 0  ;;  %v2883_v53 = vsel %vm2875_vm4, %v2860_v50, 0 }
 0x296   : > { %s10006_s17 = scalar_lea.vmem %s9726_s15, %s7553_s20 [#allocation4]  ;;  %v2310_v26 = vsub.f32 %v2308_v11, %v2309_v20  ;;  %v2317_v27 = vsub.f32 %v2315_v12, %v2316_v21  ;;  %v2324_v29 = vsub.f32 %v2322_v13, %v2323_v22  ;;  %v8568_v28 = vpack.c.bf16 %v2316_v21, %v2309_v20  ;;  %v7554_v44 = vld [vmem:[%s10652_s16] ss:$0 sm:$0xff]  ;;  %s10653_s20 = sld [smem:[#allocation34_spill]] }
 0x297   : > { %v2211_v14 = vld [vmem:[%s10006_s17] sm:$0xff]  ;;  %v2331_v23 = vsub.f32 %v2329_v16, %v2330_v24  ;;  %v8571_v43 = vpack.c.bf16 %v2330_v24, %v2323_v22  ;;  %v3348_v54 = vsel %vm2875_vm4, %v2861_v51, 0  ;;  %v2886_v55 = vand.u32 4294901760, %v2880_v52  ;;  %s10654_s15 = sld [smem:[#allocation23_spill]] }
 0x298   : > { %v2225_v17 = vsel %vm2223_vm3, %v2211_v14, 0  ;;  %8548 = vmatpush3.bf16.msra.mxu0 %v8547_v15  ;;  %v2311_v31 = vand.u32 4294901760, %v2310_v26  ;;  %v2318_v32 = vand.u32 4294901760, %v2317_v27  ;;  %v2325_v36 = vand.u32 4294901760, %v2324_v29 }
 0x299   : > { %v2296_v18 = vand.u32 4294901760, %v2225_v17  ;;  %8549 = vmatprep.subr.bf16.mxu0 %v9379_v4  ;;  %v2332_v37 = vand.u32 4294901760, %v2331_v23  ;;  %v2889_v56 = vand.u32 4294901760, %v2883_v53  ;;  %v3351_v57 = vsel %vm2875_vm4, %v2862_v46, 0 }
 0x29a   : > { %v8550_v35 = vpack.c.bf16 %v2318_v32, %v2311_v31  ;;  %v3354_v58 = vand.u32 4294901760, %v3348_v54  ;;  %v3357_v59 = vand.u32 4294901760, %v3351_v57  ;;  %v10051_v61 = vsub.f32 %v2880_v52, %v2886_v55  ;;  %p10657_p6 = scmp.ne.s32.totalorder %s10655_s1, 0 }
 0x29b   : > { %v2297_v25 = vsub.f32 %v2225_v17, %v2296_v18  ;;  %v8553_v39 = vpack.c.bf16 %v2332_v37, %v2325_v36  ;;  %v10049_v60 = vpack.c.bf16 %v2889_v56, %v2886_v55  ;;  %v10053_v62 = vsub.f32 %v2883_v53, %v2889_v56 }
 0x29c   : > { %v10055_v63 = vsub.f32 %v3348_v54, %v3354_v58  ;;  %v10057_v0 = vpack.c.bf16 %v3357_v59, %v3354_v58  ;;  %v10059_v1 = vsub.f32 %v3351_v57, %v3357_v59  ;;  %v2965_v34 = vand.u32 4294901760, %v10051_v61 }
 0x29d   : > { %v2298_v30 = vand.u32 4294901760, %v2297_v25  ;;  %8581 = vmatpush3.bf16.xpose.msra.mxu1 %v10049_v60  ;;  %v2972_v2 = vand.u32 4294901760, %v10053_v62  ;;  %v8586_v16 = vpack.c.bf16 %v10053_v62, %v10051_v61  ;;  %v9385_v21 = vmov 1983009808   ;;  %s7566_s16 = sshll.u32 %s10654_s15, 3 }
 0x29e   : > { %8582 = vmatprep.subr.bf16.mxu1 %v9379_v4  ;;  %v3433_v3 = vand.u32 4294901760, %v10055_v63  ;;  %v3440_v41 = vand.u32 4294901760, %v10059_v1  ;;  %v2966_v5 = vsub.f32 %v10051_v61, %v2965_v34  ;;  %v8604_v17 = vpack.c.bf16 %v10059_v1, %v10055_v63  ;;  %v2863_v61 = vld [vmem:[#allocation2 + $0x20] sm:$0xff] }
 0x29f   : > { %v2299_v33 = vsub.f32 %v2297_v25, %v2298_v30  ;;  %v2973_v6 = vsub.f32 %v10053_v62, %v2972_v2  ;;  %v2726_v22 = vunpack.c.l.s4 %v9385_v21  ;;  %v2728_v24 = vlaneseq }
 0x2a0   : > { %v3434_v7 = vsub.f32 %v10055_v63, %v3433_v3  ;;  %v3441_v9 = vsub.f32 %v10059_v1, %v3440_v41  ;;  %v10079_v20 = vpack.c.bf16 %v3440_v41, %v3433_v3  ;;  %v2864_v1 = vld [vmem:[#allocation2 + $0x28] sm:$0xff]  ;;  %vm6795_vm6 = vcmask 195584  }
 0x2a1   : > { %v2300_v38 = vand.u32 4294901760, %v2299_v33  ;;  %v2974_v11 = vand.u32 4294901760, %v2973_v6  ;;  %v2727_v27 = vunpack.c.0.s8 %v2726_v22  ;;  %v2729_v29 = vshrl.u32 %v2728_v24, 7 }
 0x2a2   : > { %v3435_v12 = vand.u32 4294901760, %v3434_v7  ;;  %v3442_v13 = vand.u32 4294901760, %v3441_v9 }
 0x2a3   : > { %7988 = vmatmul.mubr.f32.vlgmr.msra.gmra.mrb[0].mxu0 %v2300_v38  ;;  %v10081_v32 = vsub.s32 %v2727_v27, %v2729_v29  ;;  %v3816_v27 = vsel %vm2875_vm4, %v2863_v61, 0 }
 0x2a4   : > { %8551 = vmatpush3.bf16.msra.mxu0 %v8550_v35  ;;  %7998 = vmatprep.mubr.msk.f32.mxu0 %vm9380_vm2, %v9381_v8 }
 0x2a5   : > { %8552 = vmatprep.subr.bf16.mxu0 %v9379_v4 }
 0x2a8   : > { %8554 = vmatpush3.bf16.msra.mxu0 %v8553_v39 }
 0x2a9   : > { %8555 = vmatprep.subr.bf16.mxu0 %v9379_v4 }
 0x2ab   : > { %7999 = vmatmul.mubr.f32.vlgmr.msra.gmra.mrb[0].mxu0 %v2296_v18 }
 0x2ac   : > { %8557 = vmatpush3.bf16.msra.mxu0 %v8556_v40  ;;  %8009 = vmatprep.mubr.msk.f32.mxu0 %vm9380_vm2, %v9381_v8 }
 0x2ad   : > { %8558 = vmatprep.subr.bf16.mxu0 %v9379_v4 }
 0x2b0   : > { %8560 = vmatpush3.bf16.msra.mxu0 %v8559_v42 }
 0x2b1   : > { %8561 = vmatprep.subr.bf16.mxu0 %v9379_v4 }
 0x2b3   : > { %8010 = vmatmul.mubr.f32.vlgmr.msra.gmra.mrb[0].mxu0 %v2297_v25  ;;  %v9386_v25 = vmov 1934713408  }
 0x2b4   : > { %8563 = vmatpush3.bf16.msra.mxu0 %v8544_v10  ;;  %8020 = vmatprep.mubr.msk.f32.mxu0 %vm9380_vm2, %v9381_v8  ;;  %v2758_v26 = vunpack.c.l.s4 %v9386_v25 }
 0x2b5   : > { %8564 = vmatprep.subr.bf16.mxu0 %v9379_v4 }
 0x2b6   : > { %v2759_v31 = vunpack.c.0.s8 %v2758_v26 }
 0x2b8   : > { %8566 = vmatpush3.bf16.msra.mxu0 %v8547_v15  ;;  %v10085_v39 = vsub.s32 %v2759_v31, %v2729_v29  ;;  %v3819_v29 = vsel %vm2875_vm4, %v2864_v1, 0 }
 0x2b9   : > { %8567 = vmatprep.subr.bf16.mxu0 %v9379_v4 }
 0x2bb   : > { %8021 = vmatmul.mubr.f32.vlgmr.msra.gmra.mrb[0].mxu0 %v2298_v30 }
 0x2bc   : > { %8569 = vmatpush3.bf16.msra.mxu0 %v8568_v28  ;;  %8031 = vmatprep.mubr.msk.f32.mxu0 %vm9380_vm2, %v9381_v8 }
 0x2bd   : > { %8570 = vmatprep.subr.bf16.mxu0 %v9379_v4 }
 0x2c0   : > { %8572 = vmatpush3.bf16.msra.mxu0 %v8571_v43 }
 0x2c1   : > { %8573 = vmatprep.subr.bf16.mxu0 %v9379_v4 }
 0x2c3   : > { %8032 = vmatmul.mubr.f32.vlgmr.msra.gmra.mrb[0].mxu0 %v2296_v18 }
 0x2c4   : > { %8575 = vmatpush3.bf16.msra.mxu0 %v8544_v10  ;;  %8042 = vmatprep.mubr.msk.f32.mxu0 %vm9380_vm2, %v9381_v8  ;;  %v2967_v10 = vand.u32 4294901760, %v2966_v5 }
 0x2c5   : > { %8576 = vmatprep.subr.bf16.mxu0 %v9379_v4 }
 0x2c6   : > { %v8583_v14 = vpack.c.bf16 %v2974_v11, %v2967_v10 }
 0x2c8   : > { %8578 = vmatpush3.bf16.msra.mxu0 %v8547_v15  ;;  %v8601_v15 = vpack.c.bf16 %v3442_v13, %v3435_v12 }
 0x2c9   : > { %8597 = vmatprep.subr.bf16.mxu0 %v9379_v4 }
 0x2cb   : > { %8043 = vmatmul.mubr.f32.vlgmr.msra.gmra.mrb[0].mxu0 %v2296_v18  ;;  %v10077_v18 = vpack.c.bf16 %v2972_v2, %v2965_v34 }
 0x2cc   : > { %8091 = vmatprep.mubr.msk.f32.mxu0 %vm9380_vm2, %v9381_v8 }
 0x2d1   : > { %8599 = vmatpush3.bf16.xpose.msra.mxu0 %v10057_v0 }
 0x2d2   : > { %8600 = vmatprep.subr.bf16.mxu0 %v9379_v4 }
 0x39e   : > { %v2708_v45 = vpop.f32.mrb[0].mxu0 }
 0x39f   : > { %v8783_v19 = vadd.f32 %v7554_v44, %v2708_v45  ;;  %v8044_v47 = vpop.f32.mrb[1].mxu0 }
 0x3a1   : > { %v10040_v48 = vmul.f32 0.35355338, %v8783_v19 }
 0x3a3   : > { %2720 = vrot.lane.b32.xlu1 %v10040_v48, %s9382_s6  ;;  %2714 = vrot.lane.b32.xlu0 %v10040_v48, %s9383_s10  ;;  %s7360_s6 = sadd.s32 %s10651_s19, %s7566_s16 }
 0x3a4   : > { %s7567_s10 = sshll.u32 %s7360_s6, 7 }
 0x3a7   : > { %2717 = vrot.lane.b32.xlu0 %v10040_v48, %s9384_s8  ;;  %s7363_s8 = sshll.u32 %s9747_s27, 4  ;;  %s10478_s8 = int_to_ptr.vmem [resolvable:$true] %s7363_s8 }
 0x415   : > { %v2721_v23 = vpop.permute.xlu1 %2720  ;;  %v2715_v30 = vpop.permute.xlu0 %2714 }
 0x416   : > { %v2739_v33 = vcombine.low %v2715_v30, %v2721_v23  ;;  %v2740_v35 = vcombine.high %v2715_v30, %v2721_v23 }
 0x418   : > { %v2747_v40 = vrot.slane %v2739_v33, %v10081_v32  ;;  %v2754_v42 = vrot.slane %v2740_v35, %v10081_v32  ;;  %v3822_v35 = vand.u32 4294901760, %v3816_v27 }
 0x419   : > { %v2718_v36 = vpop.permute.xlu0 %2717 }
 0x41a   : > { %v2723_v37 = vcombine.low %v10040_v48, %v2718_v36  ;;  %v2724_v38 = vcombine.high %v10040_v48, %v2718_v36  ;;  %v3825_v36 = vand.u32 4294901760, %v3819_v29 }
 0x41c   : > { %v2731_v28 = vrot.slane %v2723_v37, %v10081_v32  ;;  %v2738_v43 = vrot.slane %v2724_v38, %v10081_v32 }
 0x41e   : > { %v2755_v44 = vcombine.low %v2731_v28, %v2747_v40  ;;  %v2756_v45 = vcombine.high %v2731_v28, %v2747_v40  ;;  %v2771_v19 = vcombine.low %v2738_v43, %v2754_v42  ;;  %v2772_v47 = vcombine.high %v2738_v43, %v2754_v42 }
 0x41f   : > { %v10153_v42 = vsub.f32 %v3816_v27, %v3822_v35 }
 0x420   : > { %v2763_v49 = vrot.slane %v2755_v44, %v10085_v39  ;;  %v2770_v50 = vrot.slane %v2756_v45, %v10085_v39  ;;  %v2779_v48 = vrot.slane %v2771_v19, %v10085_v39  ;;  %v2786_v51 = vrot.slane %v2772_v47, %v10085_v39 }
 0x421   : > { %v3901_v19 = vand.u32 4294901760, %v10153_v42 }
 0x422   : > { %v2791_v52 = vcombine.low %v2763_v49, %v2770_v50  ;;  %v7555_v53 = vcombine.high %v2763_v49, %v2770_v50  ;;  %v2807_v46 = vcombine.low %v2779_v48, %v2786_v51  ;;  %v7556_v54 = vcombine.high %v2779_v48, %v2786_v51 }
 0x424   : > { %v2798_v55 = vrot.slane %v2791_v52, %v10081_v32  ;;  %v2806_v56 = vrot.slane %v7555_v53, %v10081_v32  ;;  %v2814_v57 = vrot.slane %v2807_v46, %v10081_v32  ;;  %v2822_v58 = vrot.slane %v7556_v54, %v10081_v32 }
 0x425   : > { %v3902_v52 = vsub.f32 %v10153_v42, %v3901_v19 }
 0x426   : > { %v2823_v59 = vcombine.low %v2798_v55, %v2806_v56  ;;  %v2839_v34 = vcombine.low %v2814_v57, %v2822_v58 }
 0x428   : > { %v2831_v2 = vrot.slane %v2823_v59, %v10085_v39  ;;  %v2847_v3 = vrot.slane %v2839_v34, %v10085_v39 }
 0x42a   : > { %v2855_v41 = vcombine.low %v2831_v2, %v2847_v3  ;;  %v2856_v5 = vcombine.high %v2831_v2, %v2847_v3 }
 0x42c   : > { %v2877_v6 = vsel %vm2875_vm4, %v2855_v41, 0  ;;  %v3345_v7 = vsel %vm2875_vm4, %v2856_v5, 0 }
 0x42d   : > { %v10103_v9 = vand.u32 4294901760, %v2877_v6  ;;  %v10105_v10 = vand.u32 4294901760, %v3345_v7 }
 0x42f   : > { %v2953_v11 = vsub.f32 %v2877_v6, %v10103_v9  ;;  %v3421_v12 = vsub.f32 %v3345_v7, %v10105_v10 }
 0x431   : > { %v2954_v13 = vand.u32 4294901760, %v2953_v11  ;;  %v3422_v21 = vand.u32 4294901760, %v3421_v12 }
 0x433   : > { %v2955_v22 = vsub.f32 %v2953_v11, %v2954_v13  ;;  %v3423_v24 = vsub.f32 %v3421_v12, %v3422_v21 }
 0x435   : > { %v2956_v25 = vand.u32 4294901760, %v2955_v22  ;;  %v3424_v26 = vand.u32 4294901760, %v3423_v24 }
 0x437   : > { %8050 = vmatmul.mubr.f32.vlgmr.msra.gmra.mrb[0].mxu1 %v2956_v25  ;;  %8092 = vmatmul.mubr.f32.vlgmr.msra.gmra.mrb[2].mxu0 %v3424_v26 }
 0x438   : > { %8584 = vmatpush3.bf16.xpose.msra.mxu1 %v8583_v14  ;;  %8602 = vmatpush3.bf16.xpose.msra.mxu0 %v8601_v15  ;;  %v2824_v14 = vcombine.high %v2798_v55, %v2806_v56  ;;  %v2840_v15 = vcombine.high %v2814_v57, %v2822_v58  ;;  %v3903_v57 = vand.u32 4294901760, %v3902_v52 }
 0x439   : > { %8056 = vmatprep.mubr.msk.f32.mxu1 %vm9380_vm2, %v9381_v8  ;;  %8585 = vmatprep.subr.bf16.mxu1 %v9379_v4 }
 0x43a   : > { %8098 = vmatprep.mubr.msk.f32.mxu0 %vm9380_vm2, %v9381_v8  ;;  %8603 = vmatprep.subr.bf16.mxu0 %v9379_v4  ;;  %v2838_v62 = vrot.slane %v2824_v14, %v10085_v39  ;;  %v2854_v63 = vrot.slane %v2840_v15, %v10085_v39 }
 0x43c   : > { %v2857_v31 = vcombine.low %v2838_v62, %v2854_v63  ;;  %v2858_v33 = vcombine.high %v2838_v62, %v2854_v63 }
 0x43e   : > { %v3813_v40 = vsel %vm2875_vm4, %v2857_v31, 0 }
 0x43f   : > { %8057 = vmatmul.mubr.f32.vlgmr.msra.gmra.mrb[0].mxu1 %v10103_v9  ;;  %8099 = vmatmul.mubr.f32.vlgmr.msra.gmra.mrb[2].mxu0 %v10105_v10  ;;  %v10161_v44 = vand.u32 4294901760, %v3813_v40 }
 0x440   : > { %8587 = vmatpush3.bf16.xpose.msra.mxu1 %v8586_v16  ;;  %8605 = vmatpush3.bf16.xpose.msra.mxu0 %v8604_v17  ;;  %v2865_v16 = vld [vmem:[#allocation2 + $0x30] sm:$0xff]  ;;  %v2866_v17 = vld [vmem:[#allocation2 + $0x38] sm:$0xff] }
 0x441   : > { %8063 = vmatprep.mubr.msk.f32.mxu1 %vm9380_vm2, %v9381_v8  ;;  %8588 = vmatprep.subr.bf16.mxu1 %v9379_v4  ;;  %v4284_v23 = vsel %vm2875_vm4, %v2865_v16, 0  ;;  %v4287_v30 = vsel %vm2875_vm4, %v2866_v17, 0  ;;  %v3889_v48 = vsub.f32 %v3813_v40, %v10161_v44 }
 0x442   : > { %8105 = vmatprep.mubr.msk.f32.mxu0 %vm9380_vm2, %v9381_v8  ;;  %8606 = vmatprep.subr.bf16.mxu0 %v9379_v4  ;;  %v4290_v37 = vand.u32 4294901760, %v4284_v23  ;;  %v4293_v38 = vand.u32 4294901760, %v4287_v30 }
 0x443   : > { %v3890_v55 = vand.u32 4294901760, %v3889_v48 }
 0x444   : > { %v10157_v28 = vsub.f32 %v4284_v23, %v4290_v37  ;;  %v10159_v43 = vsub.f32 %v4287_v30, %v4293_v38  ;;  %v10183_v51 = vpack.c.bf16 %v4293_v38, %v4290_v37  ;;  %v2867_v37 = vld [vmem:[#allocation3] sm:$0xff]  ;;  %v2868_v38 = vld [vmem:[#allocation3 + $0x8] sm:$0xff] }
 0x445   : > { %v3891_v2 = vsub.f32 %v3889_v48, %v3890_v55  ;;  %v4801_v40 = vand.u32 4294901760, %v2867_v37 }
 0x446   : > { %v4369_v49 = vand.u32 4294901760, %v10157_v28  ;;  %v4376_v50 = vand.u32 4294901760, %v10159_v43 }
 0x447   : > { %8064 = vmatmul.mubr.f32.vlgmr.msra.gmra.mrb[0].mxu1 %v2953_v11  ;;  %8106 = vmatmul.mubr.f32.vlgmr.msra.gmra.mrb[2].mxu0 %v3421_v12  ;;  %v3892_v6 = vand.u32 4294901760, %v3891_v2 }
 0x448   : > { %8590 = vmatpush3.bf16.xpose.msra.mxu1 %v10049_v60  ;;  %8608 = vmatpush3.bf16.xpose.msra.mxu0 %v10057_v0  ;;  %v4370_v46 = vsub.f32 %v10157_v28, %v4369_v49  ;;  %v4377_v54 = vsub.f32 %v10159_v43, %v4376_v50  ;;  %v8646_v12 = vpack.c.bf16 %v4376_v50, %v4369_v49 }
 0x449   : > { %8070 = vmatprep.mubr.msk.f32.mxu1 %vm9380_vm2, %v9381_v8  ;;  %8591 = vmatprep.subr.bf16.mxu1 %v9379_v4 }
 0x44a   : > { %8112 = vmatprep.mubr.msk.f32.mxu0 %vm9380_vm2, %v9381_v8  ;;  %8609 = vmatprep.subr.bf16.mxu0 %v9379_v4  ;;  %v4371_v59 = vand.u32 4294901760, %v4370_v46  ;;  %v4378_v34 = vand.u32 4294901760, %v4377_v54 }
 0x44c   : > { %v8637_v5 = vpack.c.bf16 %v4378_v34, %v4371_v59  ;;  %v2871_v59 = vld [vmem:[#allocation3 + $0x20] sm:$0xff]  ;;  %v2872_v34 = vld [vmem:[#allocation3 + $0x28] sm:$0xff] }
 0x44d   : > { %v5725_v2 = vand.u32 4294901760, %v2871_v59 }
 0x44f   : > { %8071 = vmatmul.mubr.f32.vlgmr.msra.gmra.mrb[0].mxu1 %v2954_v13  ;;  %8113 = vmatmul.mubr.f32.vlgmr.msra.gmra.mrb[2].mxu0 %v3422_v21 }
 0x450   : > { %8593 = vmatpush3.bf16.xpose.msra.mxu1 %v10077_v18  ;;  %8611 = vmatpush3.bf16.xpose.msra.mxu0 %v10079_v20  ;;  %v4281_v18 = vsel %vm2875_vm4, %v2858_v33, 0  ;;  %v10155_v20 = vsub.f32 %v3819_v29, %v3825_v36 }
 0x451   : > { %8077 = vmatprep.mubr.msk.f32.mxu1 %vm9380_vm2, %v9381_v8  ;;  %8594 = vmatprep.subr.bf16.mxu1 %v9379_v4  ;;  %v10163_v45 = vand.u32 4294901760, %v4281_v18 }
 0x452   : > { %8119 = vmatprep.mubr.msk.f32.mxu0 %vm9380_vm2, %v9381_v8  ;;  %8612 = vmatprep.subr.bf16.mxu0 %v9379_v4  ;;  %v3908_v47 = vand.u32 4294901760, %v10155_v20 }
 0x454   : > { %v3909_v53 = vsub.f32 %v10155_v20, %v3908_v47  ;;  %v8628_v11 = vpack.c.bf16 %v3908_v47, %v3901_v19 }
 0x456   : > { %v3910_v58 = vand.u32 4294901760, %v3909_v53 }
 0x457   : > { %8078 = vmatmul.mubr.f32.vlgmr.msra.gmra.mrb[0].mxu1 %v10103_v9  ;;  %8120 = vmatmul.mubr.f32.vlgmr.msra.gmra.mrb[2].mxu0 %v10105_v10 }
 0x458   : > { %8596 = vmatpush3.bf16.xpose.msra.mxu1 %v10049_v60  ;;  %8614 = vmatpush3.bf16.xpose.msra.mxu0 %v10057_v0  ;;  %v4357_v60 = vsub.f32 %v4281_v18, %v10163_v45  ;;  %v10181_v0 = vpack.c.bf16 %v3825_v36, %v3822_v35  ;;  %v8619_v41 = vpack.c.bf16 %v3910_v58, %v3903_v57  ;;  %v4804_v18 = vand.u32 4294901760, %v2868_v38 }
 0x459   : > { %8084 = vmatprep.mubr.msk.f32.mxu1 %vm9380_vm2, %v9381_v8  ;;  %8126 = vmatprep.mubr.msk.f32.mxu0 %vm9380_vm2, %v9381_v8 }
 0x45a   : > { %8615 = vmatprep.subr.bf16.mxu1 %v9379_v4  ;;  %8633 = vmatprep.subr.bf16.mxu0 %v9379_v4  ;;  %v4358_v56 = vand.u32 4294901760, %v4357_v60 }
 0x45c   : > { %v4359_v3 = vsub.f32 %v4357_v60, %v4358_v56 }
 0x45e   : > { %v4360_v7 = vand.u32 4294901760, %v4359_v3  ;;  %v5728_v3 = vand.u32 4294901760, %v2872_v34 }
 0x45f   : > { %8085 = vmatmul.mubr.f32.vlgmr.msra.gmra.mrb[0].mxu1 %v10103_v9  ;;  %8127 = vmatmul.mubr.f32.vlgmr.msra.gmra.mrb[2].mxu0 %v10105_v10  ;;  %v8622_v9 = vpack.c.bf16 %v10155_v20, %v10153_v42  ;;  %v8640_v10 = vpack.c.bf16 %v10159_v43, %v10157_v28  ;;  %v10253_v28 = vpack.c.bf16 %v4804_v18, %v4801_v40 }
 0x460   : > { %8617 = vmatpush3.bf16.xpose.msra.mxu1 %v10181_v0  ;;  %8635 = vmatpush3.bf16.xpose.msra.mxu0 %v10183_v51  ;;  %v10255_v43 = vsub.f32 %v2867_v37, %v4801_v40 }
 0x461   : > { %8133 = vmatprep.mubr.msk.f32.mxu1 %vm9380_vm2, %v9381_v8  ;;  %8175 = vmatprep.mubr.msk.f32.mxu0 %vm9380_vm2, %v9381_v8 }
 0x462   : > { %8618 = vmatprep.subr.bf16.mxu1 %v9379_v4  ;;  %8636 = vmatprep.subr.bf16.mxu0 %v9379_v4  ;;  %v4880_v50 = vand.u32 4294901760, %v10255_v43 }
 0x467   : > { %8134 = vmatmul.mubr.f32.vlgmr.msra.gmra.mrb[2].mxu1 %v3892_v6  ;;  %8176 = vmatmul.mubr.f32.vlgmr.msra.gmra.mrb[4].mxu0 %v4360_v7  ;;  %v10279_v6 = vsub.f32 %v2872_v34, %v5728_v3  ;;  %v2873_v34 = vld [vmem:[#allocation3 + $0x30] sm:$0xff] }
 0x468   : > { %8620 = vmatpush3.bf16.xpose.msra.mxu1 %v8619_v41  ;;  %8638 = vmatpush3.bf16.xpose.msra.mxu0 %v8637_v5  ;;  %v10275_v41 = vpack.c.bf16 %v5728_v3, %v5725_v2  ;;  %v10277_v5 = vsub.f32 %v2871_v59, %v5725_v2  ;;  %v2874_v2 = vld [vmem:[#allocation3 + $0x38] sm:$0xff] }
 0x469   : > { %8140 = vmatprep.mubr.msk.f32.mxu1 %vm9380_vm2, %v9381_v8  ;;  %8182 = vmatprep.mubr.msk.f32.mxu0 %vm9380_vm2, %v9381_v8 }
 0x46a   : > { %8621 = vmatprep.subr.bf16.mxu1 %v9379_v4  ;;  %8639 = vmatprep.subr.bf16.mxu0 %v9379_v4  ;;  %v5804_v7 = vand.u32 4294901760, %v10277_v5 }
 0x46f   : > { %8141 = vmatmul.mubr.f32.vlgmr.msra.gmra.mrb[2].mxu1 %v10161_v44  ;;  %8183 = vmatmul.mubr.f32.vlgmr.msra.gmra.mrb[4].mxu0 %v10163_v45 }
 0x470   : > { %8623 = vmatpush3.bf16.xpose.msra.mxu1 %v8622_v9  ;;  %8641 = vmatpush3.bf16.xpose.msra.mxu0 %v8640_v10  ;;  %v5811_v9 = vand.u32 4294901760, %v10279_v6  ;;  %v5805_v10 = vsub.f32 %v10277_v5, %v5804_v7 }
 0x471   : > { %8147 = vmatprep.mubr.msk.f32.mxu1 %vm9380_vm2, %v9381_v8  ;;  %8189 = vmatprep.mubr.msk.f32.mxu0 %vm9380_vm2, %v9381_v8 }
 0x472   : > { %8624 = vmatprep.subr.bf16.mxu1 %v9379_v4  ;;  %8642 = vmatprep.subr.bf16.mxu0 %v9379_v4 }
 0x477   : > { %8148 = vmatmul.mubr.f32.vlgmr.msra.gmra.mrb[2].mxu1 %v3889_v48  ;;  %8190 = vmatmul.mubr.f32.vlgmr.msra.gmra.mrb[4].mxu0 %v4357_v60  ;;  %v4881_v60 = vsub.f32 %v10255_v43, %v4880_v50 }
 0x478   : > { %8626 = vmatpush3.bf16.xpose.msra.mxu1 %v10181_v0  ;;  %8644 = vmatpush3.bf16.xpose.msra.mxu0 %v10183_v51 }
 0x479   : > { %8154 = vmatprep.mubr.msk.f32.mxu1 %vm9380_vm2, %v9381_v8  ;;  %8196 = vmatprep.mubr.msk.f32.mxu0 %vm9380_vm2, %v9381_v8 }
 0x47a   : > { %8627 = vmatprep.subr.bf16.mxu1 %v9379_v4  ;;  %8645 = vmatprep.subr.bf16.mxu0 %v9379_v4 }
 0x47f   : > { %8155 = vmatmul.mubr.f32.vlgmr.msra.gmra.mrb[2].mxu1 %v3890_v55  ;;  %8197 = vmatmul.mubr.f32.vlgmr.msra.gmra.mrb[4].mxu0 %v4358_v56 }
 0x480   : > { %8629 = vmatpush3.bf16.xpose.msra.mxu1 %v8628_v11  ;;  %8647 = vmatpush3.bf16.xpose.msra.mxu0 %v8646_v12  ;;  %v5812_v11 = vsub.f32 %v10279_v6, %v5811_v9  ;;  %v5806_v12 = vand.u32 4294901760, %v5805_v10 }
 0x481   : > { %8161 = vmatprep.mubr.msk.f32.mxu1 %vm9380_vm2, %v9381_v8  ;;  %8203 = vmatprep.mubr.msk.f32.mxu0 %vm9380_vm2, %v9381_v8 }
 0x482   : > { %8630 = vmatprep.subr.bf16.mxu1 %v9379_v4  ;;  %8648 = vmatprep.subr.bf16.mxu0 %v9379_v4 }
 0x487   : > { %8162 = vmatmul.mubr.f32.vlgmr.msra.gmra.mrb[2].mxu1 %v10161_v44  ;;  %8204 = vmatmul.mubr.f32.vlgmr.msra.gmra.mrb[4].mxu0 %v10163_v45 }
 0x488   : > { %8632 = vmatpush3.bf16.xpose.msra.mxu1 %v10181_v0  ;;  %8650 = vmatpush3.bf16.xpose.msra.mxu0 %v10183_v51  ;;  %v4882_v51 = vand.u32 4294901760, %v4881_v60 }
 0x489   : > { %8168 = vmatprep.mubr.msk.f32.mxu1 %vm9380_vm2, %v9381_v8  ;;  %8210 = vmatprep.mubr.msk.f32.mxu0 %vm9380_vm2, %v9381_v8 }
 0x48a   : > { %8651 = vmatprep.subr.bf16.mxu1 %v9379_v4  ;;  %8687 = vmatprep.subr.bf16.mxu0 %v9379_v4 }
 0x48f   : > { %8169 = vmatmul.mubr.f32.vlgmr.msra.gmra.mrb[2].mxu1 %v10161_v44  ;;  %8211 = vmatmul.mubr.f32.vlgmr.msra.gmra.mrb[4].mxu0 %v10163_v45  ;;  %v10257_v44 = vsub.f32 %v2868_v38, %v4804_v18 }
 0x490   : > { %8217 = vmatprep.mubr.msk.f32.mxu1 %vm9380_vm2, %v9381_v8  ;;  %8301 = vmatprep.mubr.msk.f32.mxu0 %vm9380_vm2, %v9381_v8 }
 0x491   : > { %8653 = vmatpush3.bf16.msra.mxu1 %v10253_v28  ;;  %v4887_v48 = vand.u32 4294901760, %v10257_v44  ;;  %v8658_v54 = vpack.c.bf16 %v10257_v44, %v10255_v43  ;;  %8689 = vmatpush3.bf16.msra.mxu0 %v10275_v41 }
 0x492   : > { %8654 = vmatprep.subr.bf16.mxu1 %v9379_v4  ;;  %8690 = vmatprep.subr.bf16.mxu0 %v9379_v4 }
 0x493   : > { %v4888_v0 = vsub.f32 %v10257_v44, %v4887_v48  ;;  %v8664_v58 = vpack.c.bf16 %v4887_v48, %v4880_v50 }
 0x495   : > { %v4889_v52 = vand.u32 4294901760, %v4888_v0 }
 0x497   : > { %v8655_v53 = vpack.c.bf16 %v4889_v52, %v4882_v51 }
 0x532   : > { %v3340_v13 = vpop.f32.mrb[0].mxu1  ;;  %v3808_v21 = vpop.f32.mrb[2].mxu0 }
 0x533   : > { %v8086_v22 = vpop.f32.mrb[1].mxu1  ;;  %v8128_v24 = vpop.f32.mrb[3].mxu0  ;;  %v4749_v25 = vsel %vm4748_vm5, %v3340_v13, -inf  ;;  %v4752_v26 = vsel %vm4748_vm5, %v3808_v21, -inf }
 0x534   : > { %4750 = vmax.xlane.f32.xlu1 %v4749_v25  ;;  %4753 = vmax.xlane.f32.xlu0 %v4752_v26  ;;  %v8694_v22 = vpack.c.bf16 %v10279_v6, %v10277_v5  ;;  %v10291_v24 = vpack.c.bf16 %v5811_v9, %v5804_v7  ;;  %v6187_v5 = vand.u32 4294901760, %v2873_v34  ;;  %v6190_v6 = vand.u32 4294901760, %v2874_v2 }
 0x536   : > { %v6265_v9 = vsub.f32 %v2873_v34, %v6187_v5  ;;  %v6272_v10 = vsub.f32 %v2874_v2, %v6190_v6 }
 0x562   : > { %v4276_v14 = vpop.f32.mrb[2].mxu1  ;;  %v4744_v15 = vpop.f32.mrb[4].mxu0 }
 0x563   : > { %v8170_v61 = vpop.f32.mrb[3].mxu1  ;;  %v8212_v62 = vpop.f32.mrb[5].mxu0  ;;  %v4755_v63 = vsel %vm4748_vm5, %v4276_v14, -inf  ;;  %v4758_v1 = vsel %vm4748_vm5, %v4744_v15, -inf }
 0x564   : > { %4756 = vmax.xlane.f32.xlu0 %v4755_v63  ;;  %4759 = vmax.xlane.f32.xlu1 %v4758_v1 }
 0x5c1   : > { %v4751_v16 = vpop.xlane.xlu1 %4750  ;;  %v4754_v17 = vpop.xlane.xlu0 %4753 }
 0x5c2   : > { %v4761_v27 = vsub.f32 %v3340_v13, %v4751_v16  ;;  %v4762_v29 = vsub.f32 %v3808_v21, %v4754_v17  ;;  %v5813_v13 = vand.u32 4294901760, %v5812_v11 }
 0x5c4   : > { %v4765_v23 = vmul.f32 1.442695, %v4761_v27  ;;  %v4767_v30 = vmul.f32 1.442695, %v4762_v29  ;;  %v10287_v21 = vpack.c.bf16 %v5813_v13, %v5806_v12  ;;  %v6266_v12 = vand.u32 4294901760, %v6265_v9 }
 0x5c5   : > { %v6273_v13 = vand.u32 4294901760, %v6272_v10 }
 0x5c6   : > { %9042 = vpow2.f32 %v4765_v23  ;;  %v2869_v23 = vld [vmem:[#allocation3 + $0x10] sm:$0xff] }
 0x5c7   : > { %9044 = vpow2.f32 %v4767_v30  ;;  %v2870_v30 = vld [vmem:[#allocation3 + $0x18] sm:$0xff] }
 0x5d0   : > { %v9043_v31 = vpop.eup %9042 }
 0x5d1   : > { %v9045_v33 = vpop.eup %9044  ;;  %v4773_v35 = vsel %vm4748_vm5, %v9043_v31, 0.0 }
 0x5d2   : > { %4774 = vadd.xlane.f32.xlu0 %v4773_v35  ;;  %v4776_v36 = vsel %vm4748_vm5, %v9045_v33, 0.0 }
 0x5d3   : > { %4777 = vadd.xlane.f32.xlu1 %v4776_v36 }
 0x5f1   : > { %v4757_v42 = vpop.xlane.xlu0 %4756  ;;  %v4760_v20 = vpop.xlane.xlu1 %4759 }
 0x5f2   : > { %v4763_v45 = vsub.f32 %v4276_v14, %v4757_v42  ;;  %v4764_v19 = vsub.f32 %v4744_v15, %v4760_v20 }
 0x5f4   : > { %v4769_v47 = vmul.f32 1.442695, %v4763_v45  ;;  %v4771_v49 = vmul.f32 1.442695, %v4764_v19 }
 0x5f6   : > { %9046 = vpow2.f32 %v4769_v47 }
 0x5f7   : > { %9048 = vpow2.f32 %v4771_v49 }
 0x600   : > { %v10265_v46 = vpop.eup %9046 }
 0x601   : > { %v10269_v55 = vpop.eup %9048  ;;  %v4779_v56 = vsel %vm4748_vm5, %v10265_v46, 0.0 }
 0x602   : > { %4780 = vadd.xlane.f32.xlu0 %v4779_v56  ;;  %v4782_v57 = vsel %vm4748_vm5, %v10269_v55, 0.0 }
 0x603   : > { %4783 = vadd.xlane.f32.xlu1 %v4782_v57 }
 0x65f   : > { %v4775_v25 = vpop.xlane.xlu0 %4774 }
 0x660   : > { %9050 = vrcp.f32 %v4775_v25  ;;  %v4778_v26 = vpop.xlane.xlu1 %4777  ;;  %v6274_v25 = vsub.f32 %v6272_v10, %v6273_v13 }
 0x661   : > { %9052 = vrcp.f32 %v4778_v26 }
 0x66a   : > { %v9051_v14 = vpop.eup %9050 }
 0x66b   : > { %v9053_v15 = vpop.eup %9052  ;;  %v4789_v61 = vmul.f32 %v9051_v14, %v9043_v31  ;;  %v5263_v31 = vand.u32 4294901760, %v2869_v23 }
 0x66c   : > { %v4790_v62 = vmul.f32 %v9053_v15, %v9045_v33  ;;  %v5266_v33 = vand.u32 4294901760, %v2870_v30  ;;  %v6275_v15 = vand.u32 4294901760, %v6274_v25 }
 0x66d   : > { %4793 = vst.msk [vmem:[%s9747_s27] sm:$0xff] %vm4748_vm5, %v4789_v61  ;;  %v4798_v63 = vsel %vm4748_vm5, %v4789_v61, 0  ;;  %v5341_v38 = vsub.f32 %v2869_v23, %v5263_v31 }
 0x66e   : > { %4794 = vst.msk [vmem:[%s9747_s27 + $0x8] sm:$0xff] %vm4748_vm5, %v4790_v62  ;;  %v4867_v1 = vand.u32 4294901760, %v4798_v63  ;;  %v5260_v36 = vsel %vm4748_vm5, %v4790_v62, 0  ;;  %v5348_v40 = vsub.f32 %v2870_v30, %v5266_v33  ;;  %v8670_v60 = vpack.c.bf16 %v5266_v33, %v5263_v31 }
 0x66f   : > { %v10312_v18 = vand.u32 4294901760, %v5260_v36  ;;  %v5342_v42 = vand.u32 4294901760, %v5341_v38 }
 0x670   : > { %v4868_v16 = vsub.f32 %v4798_v63, %v4867_v1  ;;  %v5349_v20 = vand.u32 4294901760, %v5348_v40  ;;  %v8676_v59 = vpack.c.bf16 %v5348_v40, %v5341_v38 }
 0x671   : > { %v5330_v43 = vsub.f32 %v5260_v36, %v10312_v18  ;;  %v5343_v44 = vsub.f32 %v5341_v38, %v5342_v42  ;;  %v6798_v36 = vld [vmem:[#allocation12 + $0x8] sm:$0xff] }
 0x672   : > { %v4869_v17 = vand.u32 4294901760, %v4868_v16  ;;  %v5350_v45 = vsub.f32 %v5348_v40, %v5349_v20  ;;  %v8682_v3 = vpack.c.bf16 %v5349_v20, %v5342_v42  ;;  %v6815_v38 = vand.u32 4294901760, %v6798_v36  ;;  %v6799_v42 = vld [vmem:[#allocation12 + $0x10] sm:$0xff]  ;;  %v6800_v20 = vld [vmem:[#allocation12 + $0x18] sm:$0xff] }
 0x673   : > { %v5331_v47 = vand.u32 4294901760, %v5330_v43  ;;  %v5344_v0 = vand.u32 4294901760, %v5343_v44 }
 0x674   : > { %v4870_v27 = vsub.f32 %v4868_v16, %v4869_v17  ;;  %v5351_v51 = vand.u32 4294901760, %v5350_v45 }
 0x675   : > { %v5332_v52 = vsub.f32 %v5330_v43, %v5331_v47 }
 0x676   : > { %v4871_v29 = vand.u32 4294901760, %v4870_v27 }
 0x678   : > { %8218 = vmatmul.mubr.f32.vlgmr.msra.gmra.mrb[4].mxu1 %v4871_v29 }
 0x679   : > { %8656 = vmatpush3.bf16.msra.mxu1 %v8655_v53  ;;  %8224 = vmatprep.mubr.msk.f32.mxu1 %vm9380_vm2, %v9381_v8 }
 0x67a   : > { %8657 = vmatprep.subr.bf16.mxu1 %v9379_v4 }
 0x680   : > { %8225 = vmatmul.mubr.f32.vlgmr.msra.gmra.mrb[4].mxu1 %v4867_v1 }
 0x681   : > { %8659 = vmatpush3.bf16.msra.mxu1 %v8658_v54  ;;  %8231 = vmatprep.mubr.msk.f32.mxu1 %vm9380_vm2, %v9381_v8 }
 0x682   : > { %8660 = vmatprep.subr.bf16.mxu1 %v9379_v4 }
 0x688   : > { %8232 = vmatmul.mubr.f32.vlgmr.msra.gmra.mrb[4].mxu1 %v4868_v16 }
 0x689   : > { %8662 = vmatpush3.bf16.msra.mxu1 %v10253_v28  ;;  %8238 = vmatprep.mubr.msk.f32.mxu1 %vm9380_vm2, %v9381_v8 }
 0x68a   : > { %8663 = vmatprep.subr.bf16.mxu1 %v9379_v4 }
 0x68f   : > { %v4781_v35 = vpop.xlane.xlu0 %4780 }
 0x690   : > { %9054 = vrcp.f32 %v4781_v35  ;;  %v4784_v37 = vpop.xlane.xlu1 %4783  ;;  %8239 = vmatmul.mubr.f32.vlgmr.msra.gmra.mrb[4].mxu1 %v4869_v17  ;;  %v6797_v35 = vld [vmem:[#allocation12] sm:$0xff] }
 0x691   : > { %9056 = vrcp.f32 %v4784_v37  ;;  %8665 = vmatpush3.bf16.msra.mxu1 %v8664_v58  ;;  %8245 = vmatprep.mubr.msk.f32.mxu1 %vm9380_vm2, %v9381_v8  ;;  %v6812_v37 = vand.u32 4294901760, %v6797_v35 }
 0x692   : > { %8666 = vmatprep.subr.bf16.mxu1 %v9379_v4 }
 0x693   : > { %v10398_v40 = vsub.f32 %v6797_v35, %v6812_v37 }
 0x695   : > { %v6893_v44 = vand.u32 4294901760, %v10398_v40 }
 0x698   : > { %8246 = vmatmul.mubr.f32.vlgmr.msra.gmra.mrb[4].mxu1 %v4867_v1 }
 0x699   : > { %8668 = vmatpush3.bf16.msra.mxu1 %v10253_v28  ;;  %8252 = vmatprep.mubr.msk.f32.mxu1 %vm9380_vm2, %v9381_v8 }
 0x69a   : > { %v9055_v19 = vpop.eup %9054  ;;  %8669 = vmatprep.subr.bf16.mxu1 %v9379_v4 }
 0x69b   : > { %v9057_v49 = vpop.eup %9056  ;;  %v4791_v50 = vmul.f32 %v9055_v19, %v10265_v46  ;;  %v8673_v46 = vpack.c.bf16 %v5351_v51, %v5344_v0  ;;  %v6818_v19 = vand.u32 4294901760, %v6799_v42 }
 0x69c   : > { %v4792_v48 = vmul.f32 %v9057_v49, %v10269_v55  ;;  %v5333_v55 = vand.u32 4294901760, %v5332_v52 }
 0x69d   : > { %4795 = vst.msk [vmem:[%s9747_s27 + $0x10] sm:$0xff] %vm4748_vm5, %v4791_v50  ;;  %v5722_v28 = vsel %vm4748_vm5, %v4791_v50, 0  ;;  %v10410_v51 = vsub.f32 %v6799_v42, %v6818_v19 }
 0x69e   : > { %4796 = vst.msk [vmem:[%s9747_s27 + $0x18] sm:$0xff] %vm4748_vm5, %v4792_v48  ;;  %v10326_v53 = vand.u32 4294901760, %v5722_v28  ;;  %v6184_v7 = vsel %vm4748_vm5, %v4792_v48, 0 }
 0x69f   : > { %v6253_v11 = vand.u32 4294901760, %v6184_v7 }
 0x6a0   : > { %8253 = vmatmul.mubr.f32.vlgmr.msra.gmra.mrb[4].mxu1 %v4867_v1  ;;  %v5792_v54 = vsub.f32 %v5722_v28, %v10326_v53  ;;  %v8718_v1 = vpack.c.bf16 %v6273_v13, %v6266_v12 }
 0x6a1   : > { %8671 = vmatpush3.bf16.msra.mxu1 %v8670_v60  ;;  %8259 = vmatprep.mubr.msk.f32.mxu1 %vm9380_vm2, %v9381_v8 }
 0x6a2   : > { %8672 = vmatprep.subr.bf16.mxu1 %v9379_v4  ;;  %v5793_v56 = vand.u32 4294901760, %v5792_v54 }
 0x6a4   : > { %8260 = vmatmul.mubr.f32.vlgmr.msra.gmra.mrb[6].mxu1 %v5333_v55  ;;  %v5794_v57 = vsub.f32 %v5792_v54, %v5793_v56 }
 0x6a5   : > { %8674 = vmatpush3.bf16.msra.mxu1 %v8673_v46  ;;  %8266 = vmatprep.mubr.msk.f32.mxu1 %vm9380_vm2, %v9381_v8 }
 0x6a6   : > { %v5795_v58 = vand.u32 4294901760, %v5794_v57  ;;  %8675 = vmatprep.subr.bf16.mxu1 %v9379_v4  ;;  %v6907_v57 = vand.u32 4294901760, %v10410_v51 }
 0x6a8   : > { %8302 = vmatmul.mubr.f32.vlgmr.msra.gmra.mrb[6].mxu0 %v5795_v58 }
 0x6a9   : > { %8692 = vmatpush3.bf16.msra.mxu0 %v10287_v21  ;;  %8308 = vmatprep.mubr.msk.f32.mxu0 %vm9380_vm2, %v9381_v8  ;;  %v6254_v21 = vsub.f32 %v6184_v7, %v6253_v11 }
 0x6aa   : > { %8693 = vmatprep.subr.bf16.mxu0 %v9379_v4 }
 0x6ab   : > { %v6255_v26 = vand.u32 4294901760, %v6254_v21 }
 0x6ac   : > { %8267 = vmatmul.mubr.f32.vlgmr.msra.gmra.mrb[6].mxu1 %v10312_v18 }
 0x6ad   : > { %8677 = vmatpush3.bf16.msra.mxu1 %v8676_v59  ;;  %8273 = vmatprep.mubr.msk.f32.mxu1 %vm9380_vm2, %v9381_v8  ;;  %v6256_v61 = vsub.f32 %v6254_v21, %v6255_v26 }
 0x6ae   : > { %8678 = vmatprep.subr.bf16.mxu1 %v9379_v4 }
 0x6af   : > { %v6257_v63 = vand.u32 4294901760, %v6256_v61 }
 0x6b0   : > { %8309 = vmatmul.mubr.f32.vlgmr.msra.gmra.mrb[6].mxu0 %v10326_v53 }
 0x6b1   : > { %8695 = vmatpush3.bf16.msra.mxu0 %v8694_v22  ;;  %8315 = vmatprep.mubr.msk.f32.mxu0 %vm9380_vm2, %v9381_v8  ;;  %v6267_v22 = vsub.f32 %v6265_v9, %v6266_v12 }
 0x6b2   : > { %8696 = vmatprep.subr.bf16.mxu0 %v9379_v4 }
 0x6b3   : > { %v6268_v14 = vand.u32 4294901760, %v6267_v22 }
 0x6b4   : > { %8274 = vmatmul.mubr.f32.vlgmr.msra.gmra.mrb[6].mxu1 %v5330_v43 }
 0x6b5   : > { %8680 = vmatpush3.bf16.msra.mxu1 %v8670_v60  ;;  %8280 = vmatprep.mubr.msk.f32.mxu1 %vm9380_vm2, %v9381_v8  ;;  %v8709_v62 = vpack.c.bf16 %v6275_v15, %v6268_v14 }
 0x6b6   : > { %8681 = vmatprep.subr.bf16.mxu1 %v9379_v4 }
 0x6b8   : > { %8316 = vmatmul.mubr.f32.vlgmr.msra.gmra.mrb[6].mxu0 %v5792_v54 }
 0x6b9   : > { %8698 = vmatpush3.bf16.msra.mxu0 %v10275_v41  ;;  %8322 = vmatprep.mubr.msk.f32.mxu0 %vm9380_vm2, %v9381_v8 }
 0x6ba   : > { %8699 = vmatprep.subr.bf16.mxu0 %v9379_v4 }
 0x6bc   : > { %8281 = vmatmul.mubr.f32.vlgmr.msra.gmra.mrb[6].mxu1 %v5331_v47  ;;  %v6821_v47 = vand.u32 4294901760, %v6800_v20 }
 0x6bd   : > { %8683 = vmatpush3.bf16.msra.mxu1 %v8682_v3  ;;  %8287 = vmatprep.mubr.msk.f32.mxu1 %vm9380_vm2, %v9381_v8 }
 0x6be   : > { %8684 = vmatprep.subr.bf16.mxu1 %v9379_v4  ;;  %v10412_v28 = vsub.f32 %v6800_v20, %v6821_v47 }
 0x6c0   : > { %8323 = vmatmul.mubr.f32.vlgmr.msra.gmra.mrb[6].mxu0 %v5793_v56  ;;  %v6914_v58 = vand.u32 4294901760, %v10412_v28 }
 0x6c1   : > { %8701 = vmatpush3.bf16.msra.mxu0 %v10291_v24  ;;  %8329 = vmatprep.mubr.msk.f32.mxu0 %vm9380_vm2, %v9381_v8  ;;  %v8706_v24 = vpack.c.bf16 %v6190_v6, %v6187_v5  ;;  %v6908_v6 = vsub.f32 %v10410_v51, %v6907_v57 }
 0x6c2   : > { %8702 = vmatprep.subr.bf16.mxu0 %v9379_v4  ;;  %v6915_v7 = vsub.f32 %v10412_v28, %v6914_v58  ;;  %v8751_v20 = vpack.c.bf16 %v6914_v58, %v6907_v57 }
 0x6c3   : > { %v6909_v13 = vand.u32 4294901760, %v6908_v6 }
 0x6c4   : > { %8288 = vmatmul.mubr.f32.vlgmr.msra.gmra.mrb[6].mxu1 %v10312_v18 }
 0x6c5   : > { %8686 = vmatpush3.bf16.msra.mxu1 %v8670_v60  ;;  %8294 = vmatprep.mubr.msk.f32.mxu1 %vm9380_vm2, %v9381_v8  ;;  %v6894_v60 = vsub.f32 %v10398_v40, %v6893_v44 }
 0x6c6   : > { %8705 = vmatprep.subr.bf16.mxu1 %v9379_v4 }
 0x6c7   : > { %v6895_v55 = vand.u32 4294901760, %v6894_v60 }
 0x6c8   : > { %8330 = vmatmul.mubr.f32.vlgmr.msra.gmra.mrb[6].mxu0 %v10326_v53 }
 0x6c9   : > { %8704 = vmatpush3.bf16.msra.mxu0 %v10275_v41  ;;  %8336 = vmatprep.mubr.msk.f32.mxu0 %vm9380_vm2, %v9381_v8  ;;  %v8712_v41 = vpack.c.bf16 %v6272_v10, %v6265_v9 }
 0x6ca   : > { %8723 = vmatprep.subr.bf16.mxu0 %v9379_v4 }
 0x6cc   : > { %8295 = vmatmul.mubr.f32.vlgmr.msra.gmra.mrb[6].mxu1 %v10312_v18  ;;  %v10400_v18 = vsub.f32 %v6798_v36, %v6815_v38 }
 0x6cd   : > { %8707 = vmatpush3.bf16.msra.mxu1 %v8706_v24  ;;  %8343 = vmatprep.mubr.msk.f32.mxu1 %vm9380_vm2, %v9381_v8 }
 0x6ce   : > { %8708 = vmatprep.subr.bf16.mxu1 %v9379_v4  ;;  %v6900_v45 = vand.u32 4294901760, %v10400_v18 }
 0x6d0   : > { %8337 = vmatmul.mubr.f32.vlgmr.msra.gmra.mrb[6].mxu0 %v10326_v53  ;;  %8344 = vmatmul.mubr.f32.vlgmr.msra.gmra.mrb[8].mxu1 %v6257_v63  ;;  %v6901_v0 = vsub.f32 %v10400_v18, %v6900_v45 }
 0x6d1   : > { %8710 = vmatpush3.bf16.msra.mxu1 %v8709_v62  ;;  %8350 = vmatprep.mubr.msk.f32.mxu1 %vm9380_vm2, %v9381_v8 }
 0x6d2   : > { %8711 = vmatprep.subr.bf16.mxu1 %v9379_v4  ;;  %8389 = vmatprep.mubr.msk.f32.mxu0 %vm9380_vm2, %v9381_v8  ;;  %v6902_v56 = vand.u32 4294901760, %v6901_v0 }
 0x6d4   : > { %v8730_v5 = vpack.c.bf16 %v6902_v56, %v6895_v55 }
 0x6d8   : > { %8351 = vmatmul.mubr.f32.vlgmr.msra.gmra.mrb[8].mxu1 %v6253_v11 }
 0x6d9   : > { %8713 = vmatpush3.bf16.msra.mxu1 %v8712_v41  ;;  %8357 = vmatprep.mubr.msk.f32.mxu1 %vm9380_vm2, %v9381_v8 }
 0x6da   : > { %8714 = vmatprep.subr.bf16.mxu1 %v9379_v4 }
 0x6e0   : > { %8358 = vmatmul.mubr.f32.vlgmr.msra.gmra.mrb[8].mxu1 %v6254_v21  ;;  %v6916_v21 = vand.u32 4294901760, %v6915_v7 }
 0x6e1   : > { %8716 = vmatpush3.bf16.msra.mxu1 %v8706_v24  ;;  %8364 = vmatprep.mubr.msk.f32.mxu1 %vm9380_vm2, %v9381_v8 }
 0x6e2   : > { %8717 = vmatprep.subr.bf16.mxu1 %v9379_v4  ;;  %v8733_v14 = vpack.c.bf16 %v6916_v21, %v6909_v13 }
 0x6e8   : > { %8365 = vmatmul.mubr.f32.vlgmr.msra.gmra.mrb[8].mxu1 %v6255_v26 }
 0x6e9   : > { %8719 = vmatpush3.bf16.msra.mxu1 %v8718_v1  ;;  %8371 = vmatprep.mubr.msk.f32.mxu1 %vm9380_vm2, %v9381_v8 }
 0x6ea   : > { %8720 = vmatprep.subr.bf16.mxu1 %v9379_v4 }
 0x6f0   : > { %8372 = vmatmul.mubr.f32.vlgmr.msra.gmra.mrb[8].mxu1 %v6253_v11 }
 0x6f1   : > { %8722 = vmatpush3.bf16.msra.mxu1 %v8706_v24  ;;  %8378 = vmatprep.mubr.msk.f32.mxu1 %vm9380_vm2, %v9381_v8 }
 0x6f2   : > { %8729 = vmatprep.subr.bf16.mxu1 %v9379_v4 }
 0x6f8   : > { %8379 = vmatmul.mubr.f32.vlgmr.msra.gmra.mrb[8].mxu1 %v6253_v11 }
 0x6f9   : > { %8400 = vmatprep.mubr.msk.f32.mxu1 %vm9380_vm2, %v9381_v8  ;;  %8731 = vmatpush3.bf16.msra.mxu1 %v8730_v5 }
 0x6fa   : > { %8732 = vmatprep.subr.bf16.mxu1 %v9379_v4 }
 0x6fd   : > { %8734 = vmatpush3.bf16.msra.mxu1 %v8733_v14 }
 0x6fe   : > { %8741 = vmatprep.subr.bf16.mxu1 %v9379_v4 }
 0x773   : > { %v5255_v16 = vpop.f32.mrb[4].mxu1 }
 0x774   : > { %v8254_v17 = vpop.f32.mrb[5].mxu1 }
 0x79f   : > { %v5717_v27 = vpop.f32.mrb[6].mxu1 }
 0x7a0   : > { %v8296_v29 = vpop.f32.mrb[7].mxu1 }
 0x7a3   : > { %v6179_v23 = vpop.f32.mrb[6].mxu0 }
 0x7a4   : > { %v6645_v30 = vcombine.low %v5255_v16, %v6179_v23  ;;  %v6646_v31 = vcombine.high %v5255_v16, %v6179_v23  ;;  %v8338_v33 = vpop.f32.mrb[7].mxu0 }
 0x7a5   : > { %v8727_v33 = vpack.c.bf16 %v6821_v47, %v6818_v19 }
 0x7a6   : > { %v6653_v52 = vrot.slane %v6645_v30, %v10081_v32  ;;  %v6660_v53 = vrot.slane %v6646_v31, %v10081_v32 }
 0x7cb   : > { %v6641_v43 = vpop.f32.mrb[8].mxu1 }
 0x7cc   : > { %v6661_v49 = vcombine.low %v5717_v27, %v6641_v43  ;;  %v6662_v50 = vcombine.high %v5717_v27, %v6641_v43  ;;  %v8380_v48 = vpop.f32.mrb[9].mxu1  ;;  %v8724_v27 = vpack.c.bf16 %v6815_v38, %v6812_v37  ;;  %v8736_v37 = vpack.c.bf16 %v10400_v18, %v10398_v40 }
 0x7cd   : > { %v8748_v38 = vpack.c.bf16 %v6900_v45, %v6893_v44 }
 0x7ce   : > { %v6669_v54 = vrot.slane %v6661_v49, %v10081_v32  ;;  %v6676_v46 = vrot.slane %v6662_v50, %v10081_v32  ;;  %8725 = vmatpush3.bf16.msra.mxu0 %v8724_v27 }
 0x7cf   : > { %8726 = vmatprep.subr.bf16.mxu0 %v9379_v4 }
 0x7d0   : > { %v6677_v59 = vcombine.low %v6653_v52, %v6669_v54  ;;  %v6678_v34 = vcombine.high %v6653_v52, %v6669_v54  ;;  %v6693_v2 = vcombine.low %v6660_v53, %v6676_v46  ;;  %v6694_v3 = vcombine.high %v6660_v53, %v6676_v46 }
 0x7d2   : > { %v6685_v9 = vrot.slane %v6677_v59, %v10085_v39  ;;  %v6692_v10 = vrot.slane %v6678_v34, %v10085_v39  ;;  %v6701_v11 = vrot.slane %v6693_v2, %v10085_v39  ;;  %v6708_v12 = vrot.slane %v6694_v3, %v10085_v39  ;;  %8728 = vmatpush3.bf16.msra.mxu0 %v8727_v33 }
 0x7d3   : > { %8735 = vmatprep.subr.bf16.mxu0 %v9379_v4 }
 0x7d4   : > { %v6713_v22 = vcombine.low %v6685_v9, %v6692_v10  ;;  %v7557_v25 = vcombine.high %v6685_v9, %v6692_v10  ;;  %v6729_v26 = vcombine.low %v6701_v11, %v6708_v12  ;;  %v7558_v24 = vcombine.high %v6701_v11, %v6708_v12  ;;  %v9060_v9 = vld [vmem:[%s10006_s17] sm:$0xff]  ;;  %s10656_s17 = sld [smem:[#allocation38_spill]] }
 0x7d6   : > { %v6720_v15 = vrot.slane %v6713_v22, %v10081_v32  ;;  %v6728_v61 = vrot.slane %v7557_v25, %v10081_v32  ;;  %v6736_v62 = vrot.slane %v6729_v26, %v10081_v32  ;;  %v6744_v63 = vrot.slane %v7558_v24, %v10081_v32 }
 0x7d8   : > { %v6746_v41 = vcombine.high %v6720_v15, %v6728_v61  ;;  %v6762_v1 = vcombine.high %v6736_v62, %v6744_v63  ;;  %v6745_v16 = vcombine.low %v6720_v15, %v6728_v61  ;;  %v6761_v17 = vcombine.low %v6736_v62, %v6744_v63 }
 0x7da   : > { %v6760_v29 = vrot.slane %v6746_v41, %v10085_v39  ;;  %v6776_v23 = vrot.slane %v6762_v1, %v10085_v39  ;;  %v6753_v30 = vrot.slane %v6745_v16, %v10085_v39  ;;  %v6769_v31 = vrot.slane %v6761_v17, %v10085_v39  ;;  %s10476_s28 = scalar_lea.hbm %s10656_s17, %s7567_s10 }
 0x7db   : > { %v8739_v39 = vpack.c.bf16 %v10412_v28, %v10410_v51  ;;  %v7559_v28 = vld [vmem:[%s10653_s20] ss:$0 sm:$0xff]  ;;  %s9203_s20 = scalar_lea.vmem %s10478_s8, 512 }
 0x7dc   : > { %v6779_v35 = vcombine.low %v6760_v29, %v6776_v23  ;;  %v6778_v32 = vcombine.high %v6753_v30, %v6769_v31  ;;  %v6780_v36 = vcombine.high %v6760_v29, %v6776_v23  ;;  %v6777_v42 = vcombine.low %v6753_v30, %v6769_v31  ;;  %p9204_p4 = scmp.ne.s32.totalorder %s10478_s8, %s9203_s20 }
 0x7de   : > { %6786 = vrot.lane.b32.xlu1 %v6779_v35, %s9387_s11  ;;  %6782 = vrot.lane.b32.xlu0 %v6778_v32, %s10610_s4  ;;  %p9205_p10 = pnand %p9204_p4, %p10657_p6  ;;  %s9390_s4 = smov [#allocation14]  }
 0x7df   : > { %s9207_s16 = sshll.u32 %s9390_s4, 4  ;;  %s9208_s16 = int_to_ptr.vmem [resolvable:$false] %s9207_s16 }
 0x7e0   : > { %p9206_p13 = pneg %p9205_p10  ;;  %s9209_s27 = scalar_lea.vmem %s9208_s16, 1024 }
 0x7e1   : > { %p9210_p11 = scmp.lt.s32.totalorder %s10478_s8, %s9208_s16  ;;  %p9211_p0 = scmp.lt.s32.totalorder %s9209_s27, %s9203_s20 }
 0x7e2   : > { %6790 = vrot.lane.b32.xlu1 %v6780_v36, %s9389_s18 }
 0x7e3   : > { %p9212_p5 = por %p9211_p0, %p9210_p11 }
 0x7e5   : > { %p9213_p8 = pnand %p9212_p5, %p9206_p13 }
 0x850   : > { %v6787_v43 = vpop.permute.xlu1 %6786  ;;  %v6783_v19 = vpop.permute.xlu0 %6782 }
 0x851   : > { %v6793_v47 = vsel %vm2875_vm4, %v6777_v42, %v6783_v19 }
 0x852   : > { %v6794_v50 = vsel %vm4748_vm5, %v6793_v47, %v6787_v43 }
 0x854   : > { %v6791_v49 = vpop.permute.xlu1 %6790 }
 0x855   : > { %v6796_v48 = vsel %vm6795_vm6, %v6794_v50, %v6791_v49 }
 0x856   : > { %v6809_v60 = vsel %vm2223_vm3, %v6796_v48, 0 }
 0x857   : > { %v6880_v0 = vand.u32 4294901760, %v6809_v60 }
 0x859   : > { %v6881_v52 = vsub.f32 %v6809_v60, %v6880_v0  ;;  %8401 = vmatmul.mubr.f32.vlgmr.msra.gmra.mrb[10].mxu1 %v6880_v0 }
 0x85a   : > { %8743 = vmatpush3.bf16.msra.mxu1 %v8724_v27  ;;  %8422 = vmatprep.mubr.msk.f32.mxu1 %vm9380_vm2, %v9381_v8 }
 0x85b   : > { %8744 = vmatprep.subr.bf16.mxu1 %v9379_v4  ;;  %v6882_v40 = vand.u32 4294901760, %v6881_v52 }
 0x85d   : > { %v6883_v18 = vsub.f32 %v6881_v52, %v6882_v40 }
 0x85e   : > { %8746 = vmatpush3.bf16.msra.mxu1 %v8727_v33 }
 0x85f   : > { %8753 = vmatprep.subr.bf16.mxu1 %v9379_v4  ;;  %v6884_v44 = vand.u32 4294901760, %v6883_v18 }
 0x861   : > { %8423 = vmatmul.mubr.f32.vlgmr.msra.gmra.mrb[12].mxu1 %v6882_v40  ;;  %8390 = vmatmul.mubr.f32.vlgmr.msra.gmra.mrb[8].mxu0 %v6884_v44 }
 0x862   : > { %8737 = vmatpush3.bf16.msra.mxu0 %v8736_v37  ;;  %8755 = vmatpush3.bf16.msra.mxu1 %v8724_v27 }
 0x863   : > { %8738 = vmatprep.subr.bf16.mxu0 %v9379_v4  ;;  %8756 = vmatprep.subr.bf16.mxu1 %v9379_v4 }
 0x864   : > { %8411 = vmatprep.mubr.msk.f32.mxu0 %vm9380_vm2, %v9381_v8  ;;  %8444 = vmatprep.mubr.msk.f32.mxu1 %vm9380_vm2, %v9381_v8 }
 0x866   : > { %8740 = vmatpush3.bf16.msra.mxu0 %v8739_v39  ;;  %8758 = vmatpush3.bf16.msra.mxu1 %v8727_v33 }
 0x867   : > { %8747 = vmatprep.subr.bf16.mxu0 %v9379_v4 }
 0x869   : > { %8412 = vmatmul.mubr.f32.vlgmr.msra.gmra.mrb[10].mxu0 %v6881_v52  ;;  %8445 = vmatmul.mubr.f32.vlgmr.msra.gmra.mrb[14].mxu1 %v6880_v0 }
 0x86a   : > { %8749 = vmatpush3.bf16.msra.mxu0 %v8748_v38  ;;  %8433 = vmatprep.mubr.msk.f32.mxu0 %vm9380_vm2, %v9381_v8 }
 0x86b   : > { %8750 = vmatprep.subr.bf16.mxu0 %v9379_v4 }
 0x86e   : > { %8752 = vmatpush3.bf16.msra.mxu0 %v8751_v20 }
 0x871   : > { %8434 = vmatmul.mubr.f32.vlgmr.msra.gmra.mrb[12].mxu0 %v6880_v0 }
 0x92c   : > { %v6977_v45 = vpop.f32.mrb[10].mxu1 }
 0x92d   : > { %v8402_v51 = vpop.f32.mrb[11].mxu1 }
 0x934   : > { %v7134_v53 = vpop.f32.mrb[12].mxu1  ;;  %v6886_v54 = vpop.f32.mrb[8].mxu0 }
 0x935   : > { %v6887_v46 = vadd.f32 %v7559_v28, %v6886_v54  ;;  %v8424_v55 = vpop.f32.mrb[13].mxu1  ;;  %v8391_v56 = vpop.f32.mrb[9].mxu0 }
 0x937   : > { %v6978_v57 = vadd.f32 %v6977_v45, %v6887_v46 }
 0x93c   : > { %v7057_v58 = vpop.f32.mrb[10].mxu0  ;;  %v7292_v59 = vpop.f32.mrb[14].mxu1 }
 0x93d   : > { %v7058_v8 = vadd.f32 %v7057_v58, %v6978_v57  ;;  %v8413_v34 = vpop.f32.mrb[11].mxu0  ;;  %v8446_v4 = vpop.f32.mrb[15].mxu1 }
 0x93f   : > { %v7135_v2 = vadd.f32 %v7134_v53, %v7058_v8 }
 0x944   : > { %v7217_v3 = vpop.f32.mrb[12].mxu0 }
 0x945   : > { %v7218_v5 = vadd.f32 %v7217_v3, %v7135_v2  ;;  %v8435_v6 = vpop.f32.mrb[13].mxu0 }
 0x947   : > { %v7293_v7 = vadd.f32 %v7292_v59, %v7218_v5 }
 0x949   : > { %v7296_v10 = vadd.f32 %v9060_v9, %v7293_v7 }
 0x94b   : > { %v7297_v11 = vsel %vm2223_vm3, %v7296_v10, 0.0 }
 0x94c   : > { %7298 = vadd.xlane.f32.xlu0 %v7297_v11 }
 0x9d9   : > { %v7299_v12 = vpop.xlane.xlu0 %7298 }
 0x9da   : > { %v7301_v13 = vmul.f32 0.03125, %v7299_v12 }
 0x9dc   : > { %v7302_v21 = vsub.f32 %v7296_v10, %v7301_v13 }
 0x9de   : > { %v7303_v22 = vmul.f32 %v7302_v21, %v7302_v21 }
 0x9e0   : > { %v7304_v25 = vsel %vm2223_vm3, %v7303_v22, 0.0 }
 0x9e1   : > { %7305 = vadd.xlane.f32.xlu1 %v7304_v25 }
 0x9e2   : > { %9216 = shalt.err (!%p9213_p8)
}
 0x9e3   : > { %s9217_s6 = scalar_lea.hbm %s10476_s28, 512  ;;  %s9221_s4 = scalar_lea.hbm %s10656_s17, 2048 }
 0x9e4   : > { %p9218_p12 = scmp.ne.s32.totalorder %s10476_s28, %s9217_s6  ;;  %p9222_p9 = scmp.lt.u32.totalorder %s10476_s28, %s10656_s17 }
 0x9e5   : > { %p9223_p1 = scmp.lt.u32.totalorder %s9221_s4, %s9217_s6  ;;  %p9225_p4 = scmp.lt.u32.totalorder %s9217_s6, %s10476_s28 }
 0x9e6   : > { %p9219_p2 = pnand %p9218_p12, %p10657_p6 }
 0x9e7   : > { %p9224_p3 = por %p9223_p1, %p9222_p9 }
 0x9e8   : > { %p9220_p7 = pneg %p9219_p2 }
 0x9e9   : > { %p9226_p10 = por %p9225_p4, %p9224_p3 }
 0x9eb   : > { %p9227_p13 = pnand %p9226_p10, %p9220_p7 }
 0x9ed   : > { %9230 = shalt.err (!%p9227_p13)
}
 0x9ee   : > { %s9391_s20 = smov 128   ;;  %s9392_s27 = smov 256  }
 0x9ef   : > { %s10658_s10 = smov 8   ;;  %s7564_s6 = sshll.u32 %s10654_s15, 1 }
 0x9f0   : > { %8893 = dma.vmem_to_hbm [thread:$0]  (%p10657_p6), %s10478_s8, 512, %s10476_s28, %s7334_s9, %s9391_s20, %s9392_s27, %s10658_s10  }
 0x9f1   : > { %s7345_s11 = sadd.s32 %s10651_s19, %s7564_s6  ;;  %s10659_s16 = sld [smem:[#allocation35_spill]] }
 0x9f2   : > { %s10660_s7 = sld [smem:[#allocation36_spill]]  ;;  %s7565_s8 = sshll.u32 %s7345_s11, 7 }
 0x9f3   : > { %s7349_s28 = sshll.u32 %s9745_s12, 4  ;;  %s10661_s27 = sld [smem:[#allocation37_spill]]  ;;  %s10519_s28 = int_to_ptr.vmem [resolvable:$true] %s7349_s28 }
 0x9f4   : > { %s7329_s19 = scalar_lea.sflag [#allocation6], %s9741_s3  ;;  %s9231_s6 = scalar_lea.vmem %s10519_s28, 128 }
 0x9f5   : > { %p9232_p11 = scmp.ne.s32.totalorder %s10519_s28, %s9231_s6  ;;  %s9393_s0 = smov [#allocation13]  }
 0x9f6   : > { %s9235_s5 = sshll.u32 %s9393_s0, 4  ;;  %s9236_s5 = int_to_ptr.vmem [resolvable:$false] %s9235_s5 }
 0x9f7   : > { %v7560_v61 = vld [vmem:[%s10659_s16] ss:$0 sm:$0xff]  ;;  %p9233_p0 = pnand %p9232_p11, %p10657_p6  ;;  %p9238_p8 = scmp.lt.s32.totalorder %s10519_s28, %s9236_s5 }
 0x9f8   : > { %v7561_v63 = vld [vmem:[%s10660_s7] ss:$0 sm:$0xff]  ;;  %s9237_s7 = scalar_lea.vmem %s9236_s5, 256 }
 0x9f9   : > { %s10662_s10 = smov %s10661_s27  ;;  %s10517_s15 = scalar_lea.hbm %s10661_s27, %s7565_s8 }
 0x9fa   : > { %p9234_p5 = pneg %p9233_p0  ;;  %p9239_p12 = scmp.lt.s32.totalorder %s9237_s7, %s9231_s6 }
 0x9fc   : > { %p9240_p2 = por %p9239_p12, %p9238_p8 }
 0x9fe   : > { %p9241_p7 = pnand %p9240_p2, %p9234_p5 }
 0xa6e   : > { %v7306_v26 = vpop.xlane.xlu1 %7305 }
 0xa6f   : > { %v7307_v24 = vmul.f32 0.03125, %v7306_v26 }
 0xa71   : > { %v7308_v14 = vadd.f32 1e-05, %v7307_v24 }
 0xa73   : > { %9058 = vrsqrt.f32 %v7308_v14 }
 0xa7d   : > { %v9059_v15 = vpop.eup %9058 }
 0xa7e   : > { %v7310_v62 = vmul.f32 %v9059_v15, %v7302_v21 }
 0xa80   : > { %v7318_v41 = vmul.f32 %v7560_v61, %v7310_v62 }
 0xa82   : > { %v7326_v1 = vadd.f32 %v7561_v63, %v7318_v41 }
 0xa84   : > { %7327 = vst.msk [vmem:[%s9745_s12] sm:$0xff] %vm2223_vm3, %v7326_v1 }
 0xa85   : > { %9244 = shalt.err (!%p9241_p7)
}
 0xa86   : > { %s9245_s3 = scalar_lea.hbm %s10517_s15, 128  ;;  %s9249_s4 = scalar_lea.hbm %s10662_s10, 512 }
 0xa87   : > { %p9246_p9 = scmp.ne.s32.totalorder %s10517_s15, %s9245_s3  ;;  %p9250_p4 = scmp.lt.u32.totalorder %s10517_s15, %s10662_s10 }
 0xa88   : > { %p9251_p10 = scmp.lt.u32.totalorder %s9249_s4, %s9245_s3  ;;  %p9253_p11 = scmp.lt.u32.totalorder %s9245_s3, %s10517_s15 }
 0xa89   : > { %p9247_p1 = pnand %p9246_p9, %p10657_p6 }
 0xa8a   : > { %p9252_p13 = por %p9251_p10, %p9250_p4 }
 0xa8b   : > { %p9248_p3 = pneg %p9247_p1 }
 0xa8c   : > { %p9254_p0 = por %p9253_p11, %p9252_p13 }
 0xa8e   : > { %p9255_p5 = pnand %p9254_p0, %p9248_p3 }
 0xa90   : > { %9258 = shalt.err (!%p9255_p5)
}
 0xa91   : > { %8892 = dma.vmem_to_hbm [thread:$0]  (%p10657_p6), %s10519_s28, 128, %s10517_s15, %s7329_s19  }
 0xa92 PF: > { %s10663_s8 = sld [smem:[#allocation21_spill]]  ;;  %s10664_s9 = sld [smem:[#allocation25_spill]] }
 0xa93   : > { %p8929_p8 = scmp.ge.s32.totalorder %s9365_s13, 2 }
 0xa98   : > { %s7378_s20 = sand.u32 1, %s10663_s8   ;;  %p10665_p12 = scmp.ne.s32.totalorder %s10664_s9, 0 }
 0xa99   : > { %s7379_s27 = scalar_lea.sflag [#allocation6], %s7378_s20 }
 0xa9a   : > { %p8914_p2 = pnand %p8929_p8, %p10665_p12 }
 0xa9c   : > { %9316 = dma.done.wait (!%p8914_p2), %s7379_s27, 128  }
 0xa9d   : > { %9318 = vsyncadd (!%p8914_p2), %s7379_s27, 4294967168  ;;  %s7388_s6 = scalar_lea.sflag [#allocation15], %s7378_s20 }
 0xa9e   : > { %9320 = dma.done.wait (!%p8914_p2), %s7388_s6, 512  }
 0xa9f   : > { %9322 = vsyncadd (!%p8914_p2), %s7388_s6, 4294966784  ;;  %s34_s13 = sadd.s32 1, %s9365_s13   ;;  %s10666_s1 = smov %s10679_s21 }
 0xaa0   : > { %p31_p7 = scmp.ge.s32.totalorder %s34_s13, 6   ;;  %s10667_s15 = smov %s10683_s24 }
 0xaa1   : > { %s10668_s21 = smov %s9329_s22  ;;  %s10669_s22 = smov %s9333_s23 }
 0xaa2   : > { %s10670_s23 = smov %s9675_s2  ;;  %s10671_s24 = smov %s9341_s25 }
 0xaa3   : > { %s10672_s25 = smov %s9345_s26  ;;  %s10673_s26 = smov %s9672_s14 }
 0xaa4   : > { %s10674_s27 = smov %s9357_s29  ;;  %s10675_s28 = smov %s9361_s30 }
 0xaa5   : > { %s10676_s29 = smov %s10666_s1  ;;  %s10677_s30 = smov %s10667_s15 }
 0xaa6   :  { %33 = sbr.rel (!%p31_p7) target bundleno = 27 (0x1b), region = 147 }
 0xaad   :  { %7393 = vsyncpa [#allocation5], 1 }
 0xaae   :  { %7395 = vsyncpa [#allocation5 + $0x1], 1 }
 0xaaf   :  { %7396 = vsyncpa [#allocation8], 1 }
 0xab0   :  { %7397 = vsyncpa [#allocation11], 1 }
 0xab1   :  { %7398 = vsyncpa [#allocation6], 1 }
 0xab2   :  { %7400 = vsyncpa [#allocation6 + $0x1], 1 }
 0xab3   :  { %7401 = vsyncpa [#allocation15], 1 }
 0xab4   :  { %7403 = vsyncpa [#allocation15 + $0x1], 1 }

</bundles_post_ra>
